<compile_context>
chip_gen: v7x
topology: tpu7x:2x2x1
jax: 0.10.0
libtpu: 0.0.40
codegen_flags: <defaults>
</compile_context>

<pallas_src>
import functools

import jax
import jax.numpy as jnp
from jax.experimental import pallas as pl
from jax.experimental.pallas import tpu as pltpu

_LANE = 128


def _round_up(x, m):
    return (x + m - 1) // m * m


@functools.lru_cache(maxsize=None)
def _vmem_limit_bytes():
    """Per-generation VMEM budget: ~48 MiB on v7x (64 MiB/TC), ~96 MiB v5e/v6e."""
    try:
        cap = int(pltpu.get_tpu_info().vmem_capacity_bytes)
    except Exception:
        cap = 64 * 1024 * 1024  # conservative fallback (v7x-sized)
    return min(cap * 3 // 4, 100 * 1024 * 1024)


# ----------------------------------------------------------------------------
# Kernels
# ----------------------------------------------------------------------------
def _feature_transform_kernel(x_ref, w_ref, o_ref):
    # One row-tile of X (or H) times the full (small, VMEM-resident) weight.
    o_ref[...] = jnp.dot(
        x_ref[...], w_ref[...], preferred_element_type=jnp.float32
    ).astype(o_ref.dtype)


def _aggregate_kernel(a_ref, f_ref, b_ref, o_ref, acc_ref, *,
                      resident_tk, log_softmax_cols):
    """acc += A[i,k] @ F[k]; on the last k-step apply bias + epilogue.

    resident_tk is None  -> f_ref is the streamed (tk, h) block for step k.
    resident_tk is int   -> f_ref is the full VMEM-resident F; slice in-kernel.
    log_softmax_cols None -> epilogue = bias + ReLU             (CRD layer)
    log_softmax_cols C    -> epilogue = bias + masked log_softmax (CLS layer)
    """
    k = pl.program_id(1)

    @pl.when(k == 0)
    def _init():
        acc_ref[...] = jnp.zeros_like(acc_ref)

    if resident_tk is None:
        f_blk = f_ref[...]
    else:
        start = pl.multiple_of(k * resident_tk, resident_tk)
        f_blk = f_ref[pl.ds(start, resident_tk), :]

    acc_ref[...] += jnp.dot(
        a_ref[...], f_blk, preferred_element_type=jnp.float32
    )

    @pl.when(k == pl.num_programs(1) - 1)
    def _epilogue():
        # Bias applied only once, in the epilogue (not per reduction step).
        z = acc_ref[...] + b_ref[...]
        if log_softmax_cols is None:
            o_ref[...] = jnp.maximum(z, 0.0).astype(o_ref.dtype)
        else:
            # Masked, numerically-stable log_softmax over the real class
            # columns; padded lanes get -inf and are sliced off outside.
            col = jax.lax.broadcasted_iota(jnp.int32, z.shape, 1)
            valid = col < log_softmax_cols
            zm = jnp.where(valid, z, -jnp.inf)
            m = jnp.max(zm, axis=1, keepdims=True)
            s = zm - m
            e = jnp.where(valid, jnp.exp(s), 0.0)
            lse = jnp.log(jnp.sum(e, axis=1, keepdims=True))
            o_ref[...] = (s - lse).astype(o_ref.dtype)


# ----------------------------------------------------------------------------
# pallas_call wrappers
# ----------------------------------------------------------------------------
def _feature_transform(x, w, *, tm, out_dtype):
    n_pad, f_pad = x.shape
    h_pad = w.shape[1]
    return pl.pallas_call(
        _feature_transform_kernel,
        out_shape=jax.ShapeDtypeStruct((n_pad, h_pad), out_dtype),
        grid_spec=pltpu.PrefetchScalarGridSpec(
            num_scalar_prefetch=0,
            grid=(n_pad // tm,),
            in_specs=[
                pl.BlockSpec((tm, f_pad), lambda i: (i, 0)),
                pl.BlockSpec((f_pad, h_pad), lambda i: (0, 0)),
            ],
            out_specs=pl.BlockSpec((tm, h_pad), lambda i: (i, 0)),
        ),
        compiler_params=pltpu.CompilerParams(
            dimension_semantics=("parallel",),
            vmem_limit_bytes=_vmem_limit_bytes(),
        ),
        cost_estimate=pl.CostEstimate(
            flops=2 * n_pad * f_pad * h_pad,
            transcendentals=0,
            bytes_accessed=(
                x.size * x.dtype.itemsize
                + (n_pad // tm) * w.size * w.dtype.itemsize
                + n_pad * h_pad * jnp.dtype(out_dtype).itemsize
            ),
        ),
    )(x, w)


def _aggregate(a, f, bias, *, tm, tk, out_dtype, log_softmax_cols=None):
    n_pad = a.shape[0]
    h_pad = f.shape[1]
    vmem_limit = _vmem_limit_bytes()
    out_bytes = jnp.dtype(out_dtype).itemsize

    # Decide whether F can stay resident in VMEM for the whole kernel
    # (eliminates the (n_pad/tm)x re-read of XW / HW).  Budget conservatively:
    # count F twice in case the pipeline double-buffers it, plus A double
    # buffers, the f32 accumulator, the double-buffered output and headroom.
    f_resident_bytes = 2 * f.size * f.dtype.itemsize
    fixed_bytes = (
        2 * tm * tk * a.dtype.itemsize      # A double buffer
        + tm * h_pad * 4                    # f32 accumulator scratch
        + 2 * tm * h_pad * out_bytes        # output double buffer
        + 2 * bias.size * 4                 # bias
    )
    resident_f = f_resident_bytes + fixed_bytes <= vmem_limit - (4 << 20)

    if resident_f:
        f_spec = pl.BlockSpec((n_pad, h_pad), lambda i, k: (0, 0))
        f_hbm_bytes = f.size * f.dtype.itemsize                 # one-time load
        resident_tk = tk
    else:
        f_spec = pl.BlockSpec((tk, h_pad), lambda i, k: (k, 0))
        f_hbm_bytes = (n_pad // tm) * f.size * f.dtype.itemsize  # re-read / row tile
        resident_tk = None

    kernel = functools.partial(
        _aggregate_kernel,
        resident_tk=resident_tk,
        log_softmax_cols=log_softmax_cols,
    )
    trans = n_pad * h_pad * 2 if log_softmax_cols is not None else 0

    return pl.pallas_call(
        kernel,
        out_shape=jax.ShapeDtypeStruct((n_pad, h_pad), out_dtype),
        grid_spec=pltpu.PrefetchScalarGridSpec(
            num_scalar_prefetch=0,
            grid=(n_pad // tm, n_pad // tk),
            in_specs=[
                pl.BlockSpec((tm, tk), lambda i, k: (i, k)),
                f_spec,
                pl.BlockSpec((1, h_pad), lambda i, k: (0, 0)),
            ],
            out_specs=pl.BlockSpec((tm, h_pad), lambda i, k: (i, 0)),
            scratch_shapes=[pltpu.VMEM((tm, h_pad), jnp.float32)],
        ),
        compiler_params=pltpu.CompilerParams(
            dimension_semantics=("parallel", "arbitrary"),
            vmem_limit_bytes=vmem_limit,
        ),
        cost_estimate=pl.CostEstimate(
            flops=2 * n_pad * n_pad * h_pad,
            transcendentals=trans,
            bytes_accessed=(
                a.size * a.dtype.itemsize
                + f_hbm_bytes
                + bias.size * 4
                + n_pad * h_pad * out_bytes
            ),
        ),
    )(a, f, bias)


# ----------------------------------------------------------------------------
# Tile planning & one-time adjacency preparation
# ----------------------------------------------------------------------------
def _plan_tiles(n, tm=512, tk=1024):
    """Pick aggregation tiles.

    Invariants: tk | n_pad and tm | tk (so lcm(tm, tk) == tk and padded-N is
    bounded by one tk); >= 2 row tiles when the graph allows it so v7x's two
    TensorCores both get work on the "parallel" row axis.
    """
    n128 = _round_up(max(int(n), 1), _LANE)
    tk = max(_LANE, min(_round_up(tk, _LANE), n128))
    n_pad = _round_up(n128, tk)
    tm = max(_LANE, min(_round_up(tm, _LANE), tk))
    while tk % tm:
        tm -= _LANE
    if n_pad // tm < 2 and tm > _LANE:
        tm = max(_LANE, (n_pad // 2) // _LANE * _LANE)
        while tk % tm:
            tm -= _LANE
    return n_pad, tm, tk


def prepare_adjacency(a_hat, n_pad, dtype=jnp.bfloat16):
    """Pad A_hat to (n_pad, n_pad) and cast ONCE; cache and reuse per forward.

    bf16 halves the dominant N^2 HBM bytes; pass dtype=jnp.float32 if the
    mantissa loss on the D^-1/2 normalization weights matters for your graph.
    """
    n = a_hat.shape[0]
    return jnp.pad(a_hat, ((0, n_pad - n), (0, n_pad - n))).astype(dtype)


# ----------------------------------------------------------------------------
# Full forward
# ----------------------------------------------------------------------------
@functools.partial(jax.jit, static_argnames=("n", "tm", "tk"))
def gcn_net_forward(a_p, x, w1, b1, w2, b2, *, n, tm, tk):
    """a_p: pre-padded (n_pad, n_pad) normalized adjacency (see prepare_adjacency)."""
    n_pad = a_p.shape[0]
    assert n_pad % tm == 0 and n_pad % tk == 0, (n_pad, tm, tk)

    f_in = x.shape[1]
    hidden = w1.shape[1]
    num_classes = w2.shape[1]

    f_pad = _round_up(f_in, _LANE)
    h_pad = _round_up(hidden, _LANE)
    c_pad = _round_up(num_classes, _LANE)

    # bf16 for bandwidth-bound operands; f32 accumulation in-kernel.
    x_p = jnp.pad(x, ((0, n_pad - n), (0, f_pad - f_in))).astype(jnp.bfloat16)
    w1_p = jnp.pad(w1, ((0, f_pad - f_in), (0, h_pad - hidden))).astype(jnp.bfloat16)
    w2_p = jnp.pad(w2, ((0, h_pad - hidden), (0, c_pad - num_classes))).astype(jnp.bfloat16)
    b1_p = jnp.pad(b1.reshape(1, -1), ((0, 0), (0, h_pad - hidden))).astype(jnp.float32)
    b2_p = jnp.pad(b2.reshape(1, -1), ((0, 0), (0, c_pad - num_classes))).astype(jnp.float32)

    # Big row tile for the tiny feature transforms (per-step overhead dominated):
    # a single grid step for small graphs, otherwise tk (which divides n_pad).
    tm_ft = n_pad if n_pad <= 2048 else tk

    # Layer 1 (CRD): H = relu(A @ (X @ W1) + b1).  Dropout = identity (eval).
    xw = _feature_transform(x_p, w1_p, tm=tm_ft, out_dtype=jnp.bfloat16)
    h = _aggregate(a_p, xw, b1_p, tm=tm, tk=tk, out_dtype=jnp.bfloat16)

    # Layer 2 (CLS): out = log_softmax(A @ (H @ W2) + b2, axis=1)
    hw = _feature_transform(h, w2_p, tm=tm_ft, out_dtype=jnp.bfloat16)
    z = _aggregate(
        a_p, hw, b2_p, tm=tm, tk=tk, out_dtype=jnp.float32,
        log_softmax_cols=num_classes,
    )

    return z[:n, :num_classes]


# ----------------------------------------------------------------------------
# Plain-JAX glue: dense GCN-normalized adjacency (PyG gcn_norm semantics)
# ----------------------------------------------------------------------------
def build_normalized_adjacency(edge_index, num_nodes):
    src, dst = edge_index[0], edge_index[1]
    a = jnp.zeros((num_nodes, num_nodes), jnp.float32)
    # PyG message passing sends src -> dst; duplicates scatter-ADD.
    a = a.at[dst, src].add(1.0)
    # add_remaining_self_loops: weight-1 self loop only where none exists.
    idx = jnp.arange(num_nodes)
    diag = jnp.diagonal(a)
    a = a.at[idx, idx].set(jnp.where(diag > 0, diag, 1.0))
    deg = jnp.sum(a, axis=1)
    d_inv_sqrt = jnp.where(deg > 0, 1.0 / jnp.sqrt(deg), 0.0)
    return d_inv_sqrt[:, None] * a * d_inv_sqrt[None, :]


def glorot(key, shape):
    fan_in, fan_out = shape
    limit = jnp.sqrt(6.0 / (fan_in + fan_out))
    return jax.random.uniform(key, shape, jnp.float32, -limit, limit)


if __name__ == "__main__":
    key = jax.random.PRNGKey(0)
    k_x, k_e, k_w1, k_w2 = jax.random.split(key, 4)

    # Small synthetic graph: N nodes, F input features, hidden width, C classes.
    N, F_IN, HIDDEN, C, E = 200, 16, 32, 8, 800

    x = jax.random.normal(k_x, (N, F_IN), jnp.float32)
    edge_index = jax.random.randint(k_e, (2, E), 0, N, jnp.int32)

    # GCNConv parameters (glorot weights, zero bias), deterministic init.
    w1 = glorot(k_w1, (F_IN, HIDDEN))
    b1 = jnp.zeros((HIDDEN,), jnp.float32)
    w2 = glorot(k_w2, (HIDDEN, C))
    b2 = jnp.zeros((C,), jnp.float32)

    a_hat = build_normalized_adjacency(edge_index, N)

    # Tile plan + ONE-TIME pad/bf16 cast of A_hat (hoisted out of the forward
    # path: repeated inference reuses a_p and never re-pays the N^2 convert).
    n_pad, tm, tk = _plan_tiles(N)
    a_p = prepare_adjacency(a_hat, n_pad)

    out = gcn_net_forward(a_p, x, w1, b1, w2, b2, n=N, tm=tm, tk=tk)
    out = jax.block_until_ready(out)

    # Sanity 1: shape + rows are valid log-probabilities.
    assert out.shape == (N, C)
    row_sums = jnp.sum(jnp.exp(out), axis=1)
    assert bool(jnp.all(jnp.abs(row_sums - 1.0) < 1e-4))

    # Sanity 2: matches a plain-JAX f32 reference of the same forward
    # (loose tolerance: kernel matmuls use bf16 operands, f32 accumulation).
    h_ref = jnp.maximum(a_hat @ (x @ w1) + b1[None, :], 0.0)
    z_ref = a_hat @ (h_ref @ w2) + b2[None, :]
    ref = jax.nn.log_softmax(z_ref, axis=1)
    max_err = float(jnp.max(jnp.abs(out - ref)))
    assert max_err < 0.25, max_err

    print("KERNEL_OK")
</pallas_src>

<mosaic_0001>
module attributes {stable_mosaic.version = 11 : i64} {
  func.func @_feature_transform_kernel(%arg0: i32, %arg1: memref<256x128xbf16, #tpu.memory_space<vmem>>, %arg2: memref<128x128xbf16, #tpu.memory_space<vmem>>, %arg3: memref<256x128xbf16, #tpu.memory_space<vmem>>) attributes {dimension_semantics = [#tpu.dimension_semantics<parallel>], iteration_bounds = array<i64: 1>, scalar_prefetch = 0 : i64, scratch_operands = 0 : i64, tpu.core_type = #tpu.core_type<tc>, window_params = [{transform_indices = @transform_0, window_bounds = array<i64: 256, 128>}, {pipeline_mode = #tpu.pipeline_mode<synchronous>, transform_indices = @transform_1, window_bounds = array<i64: 128, 128>}, {transform_indices = @transform_2, window_bounds = array<i64: 256, 128>}]} {
    %c0 = arith.constant 0 : index
    %c0_0 = arith.constant 0 : index
    %0 = vector.load %arg1[%c0, %c0_0] : memref<256x128xbf16, #tpu.memory_space<vmem>>, vector<256x128xbf16>
    %c0_1 = arith.constant 0 : index
    %c0_2 = arith.constant 0 : index
    %1 = vector.load %arg2[%c0_1, %c0_2] : memref<128x128xbf16, #tpu.memory_space<vmem>>, vector<128x128xbf16>
    %cst = arith.constant dense<0.000000e+00> : vector<256x128xf32>
    %2 = tpu.matmul %0, %1, %cst {dimension_numbers = #tpu.dot_dimension_numbers<[1], [0], [0], [1], [0, 0, 1, 1], [], []>} : vector<256x128xbf16>, vector<128x128xbf16>, vector<256x128xf32> -> vector<256x128xf32>
    %3 = arith.truncf %2 : vector<256x128xf32> to vector<256x128xbf16>
    %c0_3 = arith.constant 0 : index
    %c0_4 = arith.constant 0 : index
    %4 = vector.load %arg3[%c0_3, %c0_4] : memref<256x128xbf16, #tpu.memory_space<vmem>>, vector<256x128xbf16>
    tpu.vector_store %arg3[%c0_3, %c0_4], %3 {strides = array<i32>} : memref<256x128xbf16, #tpu.memory_space<vmem>>, vector<256x128xbf16>,
    return
  }
  func.func @transform_0(%arg0: i32) -> (i32, i32) {
    %c0_i32 = arith.constant 0 : i32
    %c0_i32_0 = arith.constant 0 : i32
    return %arg0, %c0_i32 : i32, i32
  }
  func.func @transform_1(%arg0: i32) -> (i32, i32) {
    %c0_i32 = arith.constant 0 : i32
    %c0_i32_0 = arith.constant 0 : i32
    %c0_i32_1 = arith.constant 0 : i32
    return %c0_i32, %c0_i32_0 : i32, i32
  }
  func.func @transform_2(%arg0: i32) -> (i32, i32) {
    %c0_i32 = arith.constant 0 : i32
    %c0_i32_0 = arith.constant 0 : i32
    return %arg0, %c0_i32 : i32, i32
  }
}

module attributes {stable_mosaic.version = 11 : i64} {
  func.func @_aggregate_kernel(%arg0: i32, %arg1: i32, %arg2: memref<128x256xbf16, #tpu.memory_space<vmem>>, %arg3: memref<256x128xbf16, #tpu.memory_space<vmem>>, %arg4: memref<1x128xf32, #tpu.memory_space<vmem>>, %arg5: memref<128x128xbf16, #tpu.memory_space<vmem>>, %arg6: memref<128x128xf32, #tpu.memory_space<vmem>>) attributes {dimension_semantics = [#tpu.dimension_semantics<parallel>, #tpu.dimension_semantics<arbitrary>], iteration_bounds = array<i64: 2, 1>, scalar_prefetch = 0 : i64, scratch_operands = 1 : i64, tpu.core_type = #tpu.core_type<tc>, window_params = [{transform_indices = @transform_0, window_bounds = array<i64: 128, 256>}, {pipeline_mode = #tpu.pipeline_mode<synchronous>, transform_indices = @transform_1, window_bounds = array<i64: 256, 128>}, {pipeline_mode = #tpu.pipeline_mode<synchronous>, transform_indices = @transform_2, window_bounds = array<i64: 1, 128>}, {transform_indices = @transform_3, window_bounds = array<i64: 128, 128>}]} {
    %c0_i32 = arith.constant 0 : i32
    %0 = arith.cmpi eq, %arg1, %c0_i32 : i32
    %1 = arith.extui %0 : i1 to i32
    %c0_i32_0 = arith.constant 0 : i32
    %2 = arith.cmpi ne, %1, %c0_i32_0 : i32
    scf.if %2 {
      %cst_9 = arith.constant 0.000000e+00 : f32
      %15 = vector.broadcast %cst_9 : f32 to vector<128x128xf32>
      %c0_10 = arith.constant 0 : index
      %c0_11 = arith.constant 0 : index
      %16 = vector.load %arg6[%c0_10, %c0_11] : memref<128x128xf32, #tpu.memory_space<vmem>>, vector<128x128xf32>
      tpu.vector_store %arg6[%c0_10, %c0_11], %15 {strides = array<i32>} : memref<128x128xf32, #tpu.memory_space<vmem>>, vector<128x128xf32>,
    } else {
    }
    %c256_i32 = arith.constant 256 : i32
    %3 = arith.muli %arg1, %c256_i32 : i32
    %4 = tpu.assume_multiple %3, 256 : i32
    %5 = arith.index_cast %4 : i32 to index
    %c0 = arith.constant 0 : index
    %6 = vector.load %arg3[%5, %c0] : memref<256x128xbf16, #tpu.memory_space<vmem>>, vector<256x128xbf16>
    %c0_1 = arith.constant 0 : index
    %c0_2 = arith.constant 0 : index
    %7 = vector.load %arg6[%c0_1, %c0_2] : memref<128x128xf32, #tpu.memory_space<vmem>>, vector<128x128xf32>
    %c0_3 = arith.constant 0 : index
    %c0_4 = arith.constant 0 : index
    %8 = vector.load %arg2[%c0_3, %c0_4] : memref<128x256xbf16, #tpu.memory_space<vmem>>, vector<128x256xbf16>
    %cst = arith.constant dense<0.000000e+00> : vector<128x128xf32>
    %9 = tpu.matmul %8, %6, %cst {dimension_numbers = #tpu.dot_dimension_numbers<[1], [0], [0], [1], [0, 0, 1, 1], [], []>} : vector<128x256xbf16>, vector<256x128xbf16>, vector<128x128xf32> -> vector<128x128xf32>
    %10 = arith.addf %7, %9 : vector<128x128xf32>
    %c0_5 = arith.constant 0 : index
    %c0_6 = arith.constant 0 : index
    %11 = vector.load %arg6[%c0_5, %c0_6] : memref<128x128xf32, #tpu.memory_space<vmem>>, vector<128x128xf32>
    tpu.vector_store %arg6[%c0_5, %c0_6], %10 {strides = array<i32>} : memref<128x128xf32, #tpu.memory_space<vmem>>, vector<128x128xf32>,
    %c0_i32_7 = arith.constant 0 : i32
    %12 = arith.cmpi eq, %arg1, %c0_i32_7 : i32
    %13 = arith.extui %12 : i1 to i32
    %c0_i32_8 = arith.constant 0 : i32
    %14 = arith.cmpi ne, %13, %c0_i32_8 : i32
    scf.if %14 {
      %c0_9 = arith.constant 0 : index
      %c0_10 = arith.constant 0 : index
      %15 = vector.load %arg6[%c0_9, %c0_10] : memref<128x128xf32, #tpu.memory_space<vmem>>, vector<128x128xf32>
      %c0_11 = arith.constant 0 : index
      %c0_12 = arith.constant 0 : index
      %16 = vector.load %arg4[%c0_11, %c0_12] : memref<1x128xf32, #tpu.memory_space<vmem>>, vector<1x128xf32>
      %17 = vector.broadcast %16 : vector<1x128xf32> to vector<128x128xf32>
      %18 = arith.addf %15, %17 : vector<128x128xf32>
      %cst_13 = arith.constant 0.000000e+00 : f32
      %19 = vector.broadcast %cst_13 : f32 to vector<128x128xf32>
      %20 = arith.maximumf %18, %19 : vector<128x128xf32>
      %21 = arith.truncf %20 : vector<128x128xf32> to vector<128x128xbf16>
      %c0_14 = arith.constant 0 : index
      %c0_15 = arith.constant 0 : index
      %22 = vector.load %arg5[%c0_14, %c0_15] : memref<128x128xbf16, #tpu.memory_space<vmem>>, vector<128x128xbf16>
      tpu.vector_store %arg5[%c0_14, %c0_15], %21 {strides = array<i32>} : memref<128x128xbf16, #tpu.memory_space<vmem>>, vector<128x128xbf16>,
    } else {
    }
    return
  }
  func.func @transform_0(%arg0: i32, %arg1: i32) -> (i32, i32) {
    %c0_i32 = arith.constant 0 : i32
    return %arg0, %arg1 : i32, i32
  }
  func.func @transform_1(%arg0: i32, %arg1: i32) -> (i32, i32) {
    %c0_i32 = arith.constant 0 : i32
    %c0_i32_0 = arith.constant 0 : i32
    %c0_i32_1 = arith.constant 0 : i32
    return %c0_i32, %c0_i32_0 : i32, i32
  }
  func.func @transform_2(%arg0: i32, %arg1: i32) -> (i32, i32) {
    %c0_i32 = arith.constant 0 : i32
    %c0_i32_0 = arith.constant 0 : i32
    %c0_i32_1 = arith.constant 0 : i32
    return %c0_i32, %c0_i32_0 : i32, i32
  }
  func.func @transform_3(%arg0: i32, %arg1: i32) -> (i32, i32) {
    %c0_i32 = arith.constant 0 : i32
    %c0_i32_0 = arith.constant 0 : i32
    return %arg0, %c0_i32 : i32, i32
  }
}

module attributes {stable_mosaic.version = 11 : i64} {
  func.func @_aggregate_kernel(%arg0: i32, %arg1: i32, %arg2: memref<128x256xbf16, #tpu.memory_space<vmem>>, %arg3: memref<256x128xbf16, #tpu.memory_space<vmem>>, %arg4: memref<1x128xf32, #tpu.memory_space<vmem>>, %arg5: memref<128x128xf32, #tpu.memory_space<vmem>>, %arg6: memref<128x128xf32, #tpu.memory_space<vmem>>) attributes {dimension_semantics = [#tpu.dimension_semantics<parallel>, #tpu.dimension_semantics<arbitrary>], iteration_bounds = array<i64: 2, 1>, scalar_prefetch = 0 : i64, scratch_operands = 1 : i64, tpu.core_type = #tpu.core_type<tc>, window_params = [{transform_indices = @transform_0, window_bounds = array<i64: 128, 256>}, {pipeline_mode = #tpu.pipeline_mode<synchronous>, transform_indices = @transform_1, window_bounds = array<i64: 256, 128>}, {pipeline_mode = #tpu.pipeline_mode<synchronous>, transform_indices = @transform_2, window_bounds = array<i64: 1, 128>}, {transform_indices = @transform_3, window_bounds = array<i64: 128, 128>}]} {
    %c0_i32 = arith.constant 0 : i32
    %0 = arith.cmpi eq, %arg1, %c0_i32 : i32
    %1 = arith.extui %0 : i1 to i32
    %c0_i32_0 = arith.constant 0 : i32
    %2 = arith.cmpi ne, %1, %c0_i32_0 : i32
    scf.if %2 {
      %cst_9 = arith.constant 0.000000e+00 : f32
      %15 = vector.broadcast %cst_9 : f32 to vector<128x128xf32>
      %c0_10 = arith.constant 0 : index
      %c0_11 = arith.constant 0 : index
      %16 = vector.load %arg6[%c0_10, %c0_11] : memref<128x128xf32, #tpu.memory_space<vmem>>, vector<128x128xf32>
      tpu.vector_store %arg6[%c0_10, %c0_11], %15 {strides = array<i32>} : memref<128x128xf32, #tpu.memory_space<vmem>>, vector<128x128xf32>,
    } else {
    }
    %c256_i32 = arith.constant 256 : i32
    %3 = arith.muli %arg1, %c256_i32 : i32
    %4 = tpu.assume_multiple %3, 256 : i32
    %5 = arith.index_cast %4 : i32 to index
    %c0 = arith.constant 0 : index
    %6 = vector.load %arg3[%5, %c0] : memref<256x128xbf16, #tpu.memory_space<vmem>>, vector<256x128xbf16>
    %c0_1 = arith.constant 0 : index
    %c0_2 = arith.constant 0 : index
    %7 = vector.load %arg6[%c0_1, %c0_2] : memref<128x128xf32, #tpu.memory_space<vmem>>, vector<128x128xf32>
    %c0_3 = arith.constant 0 : index
    %c0_4 = arith.constant 0 : index
    %8 = vector.load %arg2[%c0_3, %c0_4] : memref<128x256xbf16, #tpu.memory_space<vmem>>, vector<128x256xbf16>
    %cst = arith.constant dense<0.000000e+00> : vector<128x128xf32>
    %9 = tpu.matmul %8, %6, %cst {dimension_numbers = #tpu.dot_dimension_numbers<[1], [0], [0], [1], [0, 0, 1, 1], [], []>} : vector<128x256xbf16>, vector<256x128xbf16>, vector<128x128xf32> -> vector<128x128xf32>
    %10 = arith.addf %7, %9 : vector<128x128xf32>
    %c0_5 = arith.constant 0 : index
    %c0_6 = arith.constant 0 : index
    %11 = vector.load %arg6[%c0_5, %c0_6] : memref<128x128xf32, #tpu.memory_space<vmem>>, vector<128x128xf32>
    tpu.vector_store %arg6[%c0_5, %c0_6], %10 {strides = array<i32>} : memref<128x128xf32, #tpu.memory_space<vmem>>, vector<128x128xf32>,
    %c0_i32_7 = arith.constant 0 : i32
    %12 = arith.cmpi eq, %arg1, %c0_i32_7 : i32
    %13 = arith.extui %12 : i1 to i32
    %c0_i32_8 = arith.constant 0 : i32
    %14 = arith.cmpi ne, %13, %c0_i32_8 : i32
    scf.if %14 {
      %c0_9 = arith.constant 0 : index
      %c0_10 = arith.constant 0 : index
      %15 = vector.load %arg6[%c0_9, %c0_10] : memref<128x128xf32, #tpu.memory_space<vmem>>, vector<128x128xf32>
      %c0_11 = arith.constant 0 : index
      %c0_12 = arith.constant 0 : index
      %16 = vector.load %arg4[%c0_11, %c0_12] : memref<1x128xf32, #tpu.memory_space<vmem>>, vector<1x128xf32>
      %17 = vector.broadcast %16 : vector<1x128xf32> to vector<128x128xf32>
      %18 = arith.addf %15, %17 : vector<128x128xf32>
      %19 = tpu.iota {dimensions = array<i32: 1>} : vector<128x128xi32>
      %c8_i32 = arith.constant 8 : i32
      %20 = vector.broadcast %c8_i32 : i32 to vector<128x128xi32>
      %21 = arith.cmpi slt, %19, %20 : vector<128x128xi32>
      %cst_13 = arith.constant 0xFF800000 : f32
      %22 = vector.broadcast %cst_13 : f32 to vector<128x128xf32>
      %23 = arith.select %21, %18, %22 : vector<128x128xi1>, vector<128x128xf32>
      %cst_14 = arith.constant dense<0xFF800000> : vector<128xf32>
      %24 = vector.multi_reduction <maximumf>, %23, %cst_14 [1] : vector<128x128xf32> to vector<128xf32>
      %25 = vector.shape_cast %24 : vector<128xf32> to vector<128x1xf32>
      %26 = vector.broadcast %25 : vector<128x1xf32> to vector<128x128xf32>
      %27 = arith.subf %23, %26 : vector<128x128xf32>
      %28 = math.exp %27 : vector<128x128xf32>
      %cst_15 = arith.constant 0.000000e+00 : f32
      %29 = vector.broadcast %cst_15 : f32 to vector<128x128xf32>
      %30 = arith.select %21, %28, %29 : vector<128x128xi1>, vector<128x128xf32>
      %cst_16 = arith.constant dense<0.000000e+00> : vector<128xf32>
      %31 = vector.multi_reduction <add>, %30, %cst_16 [1] : vector<128x128xf32> to vector<128xf32>
      %32 = vector.shape_cast %31 : vector<128xf32> to vector<128x1xf32>
      %33 = math.log %32 : vector<128x1xf32>
      %34 = vector.broadcast %33 : vector<128x1xf32> to vector<128x128xf32>
      %35 = arith.subf %27, %34 : vector<128x128xf32>
      %c0_17 = arith.constant 0 : index
      %c0_18 = arith.constant 0 : index
      %36 = vector.load %arg5[%c0_17, %c0_18] : memref<128x128xf32, #tpu.memory_space<vmem>>, vector<128x128xf32>
      tpu.vector_store %arg5[%c0_17, %c0_18], %35 {strides = array<i32>} : memref<128x128xf32, #tpu.memory_space<vmem>>, vector<128x128xf32>,
    } else {
    }
    return
  }
  func.func @transform_0(%arg0: i32, %arg1: i32) -> (i32, i32) {
    %c0_i32 = arith.constant 0 : i32
    return %arg0, %arg1 : i32, i32
  }
  func.func @transform_1(%arg0: i32, %arg1: i32) -> (i32, i32) {
    %c0_i32 = arith.constant 0 : i32
    %c0_i32_0 = arith.constant 0 : i32
    %c0_i32_1 = arith.constant 0 : i32
    return %c0_i32, %c0_i32_0 : i32, i32
  }
  func.func @transform_2(%arg0: i32, %arg1: i32) -> (i32, i32) {
    %c0_i32 = arith.constant 0 : i32
    %c0_i32_0 = arith.constant 0 : i32
    %c0_i32_1 = arith.constant 0 : i32
    return %c0_i32, %c0_i32_0 : i32, i32
  }
  func.func @transform_3(%arg0: i32, %arg1: i32) -> (i32, i32) {
    %c0_i32 = arith.constant 0 : i32
    %c0_i32_0 = arith.constant 0 : i32
    return %arg0, %c0_i32 : i32, i32
  }
}

</mosaic_0001>

<bundles_post_ra>
// kernel: gcn_net_forward.5
= control target key start
LH: loop header
LB: loop body
LE: loop exit
PB: predicated region body
PF: predicated region fallthrough
CT: control target
= control target key end

     0   :  { %s1124_s12 = smov 0   ;;  %s1126_s13 = smov 0   ;;  %s1258_s0 = inlined_call_operand.vmem [shape: bf16[256,256], index: 0, kind: input, shape index: {}]   ;;  %s1259_s1 = inlined_call_operand.vmem [shape: bf16[256,128], index: 1, kind: input, shape index: {}]   ;;  %s1260_s2 = inlined_call_operand.vmem [shape: f32[1,128], index: 2, kind: input, shape index: {}]   ;;  %s1261_s3 = inlined_call_operand.vmem [shape: bf16[256,128], index: 3, kind: output, shape index: {}]  }
   0x1   :  { %s1128_s14 = smov 0  }
   0x2 LB: > { %s25_s15 = sadd.s32 1, %s1098_s13  ;;  %p815_p0 = scmp.ge.s32.totalorder %s1102_s14, 1  ;;  %s1102_s14 = sphi %s1128_s14, %s13_s14   ;;  %s1098_s13 = sphi %s1126_s13, %s1263_s13   ;;  %s1094_s12 = sphi %s1124_s12, %s1262_s12  }
   0x3   : > { %p27_p1 = scmp.ge.s32.totalorder %s25_s15, 2  ;;  %p158_p2 = scmp.lt.s32.totalorder %s1102_s14, 3 }
   0x5   : > { %s1265_s15 = smov (%p27_p1, %s25_s15), 0  ;;  %p159_p3 = pnand %p815_p0, %p158_p2 }
   0x6   : > { %v1040_v0 = vld [vmem:[%s1259_s1 + $0x40] sm:$0xff] (!%p159_p3)   ;;  %s816_s18 = sshll.u32 (!%p159_p3), %s1094_s12, 4  ;;  %v1042_v2 = vld [vmem:[%s1259_s1 + $0x48] sm:$0xff] (!%p159_p3)   ;;  %v1044_v4 = vld [vmem:[%s1259_s1 + $0x50] sm:$0xff] (!%p159_p3)  }
   0x7   : > { %162 = sbr.rel (%p159_p3) target bundleno = 288 (0x120), region = 32  ;;  %v1041_v1 = vld [vmem:[%s1259_s1] sm:$0xff] (!%p159_p3)   ;;  %936 = vmatprep.subr.bf16.mxu0 (!%p159_p3), %v1040_v0  ;;  %1000 = vmatprep.subr.bf16.mxu1 (!%p159_p3), %v1040_v0  ;;  %v1043_v3 = vld [vmem:[%s1259_s1 + $0x8] sm:$0xff] (!%p159_p3)   ;;  %p189_p4 = scmp.lt.s32.totalorder (!%p159_p3), %s816_s18, 31  ;;  %v1045_v5 = vld [vmem:[%s1259_s1 + $0x10] sm:$0xff] (!%p159_p3)  }
   0x8   : > { %937 = vmatpush3.bf16.msra.mxu0 (!%p159_p3), %v1041_v1  ;;  %1008 = vmatpush3.bf16.msra.mxu1 (!%p159_p3), %v1041_v1  ;;  %v1046_v6 = vld [vmem:[%s1259_s1 + $0x58] sm:$0xff] (!%p159_p3)   ;;  %v1048_v8 = vld [vmem:[%s1259_s1 + $0x60] sm:$0xff] (!%p159_p3)   ;;  %v1050_v10 = vld [vmem:[%s1259_s1 + $0x68] sm:$0xff] (!%p159_p3)  }
   0x9   : > { %938 = vmatprep.subr.bf16.mxu0 (!%p159_p3), %v1042_v2  ;;  %1001 = vmatprep.subr.bf16.mxu1 (!%p159_p3), %v1042_v2  ;;  %v1047_v7 = vld [vmem:[%s1259_s1 + $0x18] sm:$0xff] (!%p159_p3)   ;;  %v1049_v9 = vld [vmem:[%s1259_s1 + $0x20] sm:$0xff] (!%p159_p3)   ;;  %v1051_v13 = vld [vmem:[%s1259_s1 + $0x28] sm:$0xff] (!%p159_p3)  }
   0xa   : > { %v1052_v14 = vld [vmem:[%s1259_s1 + $0x70] sm:$0xff] (!%p159_p3)   ;;  %v1054_v16 = vld [vmem:[%s1259_s1 + $0x78] sm:$0xff] (!%p159_p3)   ;;  %v1217_v35 = vld [vmem:[%s1260_s2] ss:$0 sm:$0xff] (!%p159_p3) }
   0xb   : > { %v1053_v15 = vld [vmem:[%s1259_s1 + $0x30] sm:$0xff] (!%p159_p3)   ;;  %v1055_v17 = vld [vmem:[%s1259_s1 + $0x38] sm:$0xff] (!%p159_p3)  }
   0xc   : > { %939 = vmatpush3.bf16.msra.mxu0 (!%p159_p3), %v1043_v3  ;;  %1009 = vmatpush3.bf16.msra.mxu1 (!%p159_p3), %v1043_v3 }
   0xd   : > { %940 = vmatprep.subr.bf16.mxu0 (!%p159_p3), %v1044_v4  ;;  %1002 = vmatprep.subr.bf16.mxu1 (!%p159_p3), %v1044_v4 }
   0xe   : > { %s1267_s18 = smov (!%p189_p4, %s816_s18), 31 }
   0xf   : > { %s872_s6 = sshll.u32 %s1267_s18, 3  ;;  %s820_s5 = sshll.u32 %s1267_s18, 2 }
  0x10   : > { %941 = vmatpush3.bf16.msra.mxu0 %v1045_v5  ;;  %1010 = vmatpush3.bf16.msra.mxu1 %v1045_v5  ;;  %s1175_s11 = scalar_lea.vmem %s1258_s0, %s872_s6  ;;  %s1227_s8 = scalar_lea.vmem %s1261_s3, %s820_s5 }
  0x11   : > { %942 = vmatprep.subr.bf16.mxu0 %v1046_v6  ;;  %1003 = vmatprep.subr.bf16.mxu1 %v1046_v6  ;;  %v1058_v11 = vld [vmem:[%s1175_s11 + $0x4] ss:$8 sps:$4 sm:$0xff]   ;;  %v1056_v18 = vld [vmem:[%s1175_s11] ss:$8 sps:$4 sm:$0xff]   ;;  %v1062_v20 = vld [vmem:[%s1175_s11 + $0x14] ss:$8 sps:$4 sm:$0xff]  }
  0x12   : > { %v1061_v12 = vld [vmem:[%s1175_s11 + $0x44] ss:$8 sps:$4 sm:$0xff]   ;;  %503 = vmatprep.mubr.bf16.mxu0 %v1058_v11  ;;  %v1059_v19 = vld [vmem:[%s1175_s11 + $0x40] ss:$8 sps:$4 sm:$0xff]   ;;  %v1064_v21 = vld [vmem:[%s1175_s11 + $0x54] ss:$8 sps:$4 sm:$0xff]  }
  0x13   : > { %535 = vmatprep.mubr.bf16.mxu1 %v1061_v12  ;;  %v1066_v22 = vld [vmem:[%s1175_s11 + $0x10] ss:$8 sps:$4 sm:$0xff]   ;;  %v1068_v24 = vld [vmem:[%s1175_s11 + $0x24] ss:$8 sps:$4 sm:$0xff]   ;;  %v1072_v26 = vld [vmem:[%s1175_s11 + $0x20] ss:$8 sps:$4 sm:$0xff]  }
  0x14   : > { %943 = vmatpush3.bf16.msra.mxu0 %v1047_v7  ;;  %1011 = vmatpush3.bf16.msra.mxu1 %v1047_v7  ;;  %v1067_v23 = vld [vmem:[%s1175_s11 + $0x50] ss:$8 sps:$4 sm:$0xff]   ;;  %v1070_v25 = vld [vmem:[%s1175_s11 + $0x64] ss:$8 sps:$4 sm:$0xff]   ;;  %v1073_v27 = vld [vmem:[%s1175_s11 + $0x60] ss:$8 sps:$4 sm:$0xff]  }
  0x15   : > { %944 = vmatprep.subr.bf16.mxu0 %v1048_v8  ;;  %1004 = vmatprep.subr.bf16.mxu1 %v1048_v8  ;;  %v1074_v28 = vld [vmem:[%s1175_s11 + $0x34] ss:$8 sps:$4 sm:$0xff]   ;;  %v1078_v30 = vld [vmem:[%s1175_s11 + $0x30] ss:$8 sps:$4 sm:$0xff]  }
  0x16   : > { %v1076_v29 = vld [vmem:[%s1175_s11 + $0x74] ss:$8 sps:$4 sm:$0xff]   ;;  %v1079_v31 = vld [vmem:[%s1175_s11 + $0x70] ss:$8 sps:$4 sm:$0xff]  }
  0x18   : > { %945 = vmatpush3.bf16.msra.mxu0 %v1049_v9  ;;  %1012 = vmatpush3.bf16.msra.mxu1 %v1049_v9 }
  0x19   : > { %946 = vmatprep.subr.bf16.mxu0 %v1050_v10  ;;  %1005 = vmatprep.subr.bf16.mxu1 %v1050_v10 }
  0x1c   : > { %947 = vmatpush3.bf16.msra.mxu0 %v1051_v13  ;;  %1013 = vmatpush3.bf16.msra.mxu1 %v1051_v13 }
  0x1d   : > { %948 = vmatprep.subr.bf16.mxu0 %v1052_v14  ;;  %1006 = vmatprep.subr.bf16.mxu1 %v1052_v14 }
  0x20   : > { %949 = vmatpush3.bf16.msra.mxu0 %v1053_v15  ;;  %1014 = vmatpush3.bf16.msra.mxu1 %v1053_v15 }
  0x21   : > { %950 = vmatprep.subr.bf16.mxu0 %v1054_v16  ;;  %1007 = vmatprep.subr.bf16.mxu1 %v1054_v16 }
  0x24   : > { %951 = vmatpush3.bf16.msra.mxu0 %v1055_v17  ;;  %1015 = vmatpush3.bf16.msra.mxu1 %v1055_v17 }
  0x27   : > { %504 = vmatmul.mubr.bf16.vlgmr.msra.gmra.mrb[0].mxu0 %v1056_v18  ;;  %536 = vmatmul.mubr.bf16.vlgmr.msra.gmra.mrb[0].mxu1 %v1059_v19 }
  0x28   : > { %511 = vmatprep.mubr.bf16.mxu0 %v1062_v20  ;;  %543 = vmatprep.mubr.bf16.mxu1 %v1064_v21 }
  0x2f   : > { %512 = vmatmul.mubr.bf16.gmra.mrb[4].mxu0 %v1066_v22  ;;  %544 = vmatmul.mubr.bf16.gmra.mrb[4].mxu1 %v1067_v23 }
  0x30   : > { %519 = vmatprep.mubr.bf16.mxu0 %v1068_v24  ;;  %551 = vmatprep.mubr.bf16.mxu1 %v1070_v25 }
  0x37   : > { %520 = vmatmul.mubr.bf16.gmra.mrb[8].mxu0 %v1072_v26  ;;  %552 = vmatmul.mubr.bf16.gmra.mrb[8].mxu1 %v1073_v27 }
  0x38   : > { %527 = vmatprep.mubr.bf16.mxu0 %v1074_v28  ;;  %559 = vmatprep.mubr.bf16.mxu1 %v1076_v29 }
  0x3f   : > { %528 = vmatmul.mubr.bf16.gmra.mrb[12].mxu0 %v1078_v30  ;;  %560 = vmatmul.mubr.bf16.gmra.mrb[12].mxu1 %v1079_v31 }
  0xfa   : > { %v952_v32 = vpop.f32.mrb[0].mxu0  ;;  %v976_v33 = vpop.f32.mrb[0].mxu1 }
  0xfb   : > { %v953_v34 = vpop.f32.mrb[1].mxu0  ;;  %v977_v36 = vpop.f32.mrb[1].mxu1 }
  0xfc   : > { %v954_v37 = vadd.f32 %v953_v34, %v952_v32  ;;  %v978_v38 = vadd.f32 %v977_v36, %v976_v33  ;;  %v955_v39 = vpop.f32.mrb[2].mxu0  ;;  %v979_v40 = vpop.f32.mrb[2].mxu1 }
  0xfd   : > { %v956_v41 = vpop.f32.mrb[3].mxu0  ;;  %v980_v42 = vpop.f32.mrb[3].mxu1 }
  0xfe   : > { %v626_v43 = vadd.f32 %v954_v37, %v1217_v35  ;;  %v634_v44 = vadd.f32 %v978_v38, %v1217_v35  ;;  %v957_v45 = vadd.f32 %v956_v41, %v955_v39  ;;  %v981_v46 = vadd.f32 %v980_v42, %v979_v40 }
 0x100   : > { %v627_v47 = vadd.f32 %v957_v45, %v1217_v35  ;;  %v635_v48 = vadd.f32 %v981_v46, %v1217_v35  ;;  %v642_v49 = vmax.f32 %v626_v43, 0.0  ;;  %v650_v50 = vmax.f32 %v634_v44, 0.0 }
 0x102   : > { %v643_v51 = vmax.f32 %v627_v47, 0.0  ;;  %v651_v52 = vmax.f32 %v635_v48, 0.0  ;;  %v958_v53 = vpop.f32.mrb[4].mxu0  ;;  %v982_v54 = vpop.f32.mrb[4].mxu1 }
 0x103   : > { %v959_v55 = vpop.f32.mrb[5].mxu0  ;;  %v983_v56 = vpop.f32.mrb[5].mxu1 }
 0x104   : > { %v892_v57 = vpack.c.bf16 %v643_v51, %v642_v49  ;;  %v912_v58 = vpack.c.bf16 %v651_v52, %v650_v50  ;;  %v960_v59 = vadd.f32 %v959_v55, %v958_v53  ;;  %v984_v60 = vadd.f32 %v983_v56, %v982_v54  ;;  %v961_v61 = vpop.f32.mrb[6].mxu0  ;;  %v985_v62 = vpop.f32.mrb[6].mxu1 }
 0x105   : > { %v962_v63 = vpop.f32.mrb[7].mxu0  ;;  %v986_v0 = vpop.f32.mrb[7].mxu1 }
 0x106   : > { %893 = vst [vmem:[%s1227_s8] sm:$0xff] %v892_v57   ;;  %932 = vst [vmem:[%s1227_s8 + $0x20] sm:$0xff] %v912_v58   ;;  %v628_v1 = vadd.f32 %v960_v59, %v1217_v35  ;;  %v636_v2 = vadd.f32 %v984_v60, %v1217_v35  ;;  %v963_v3 = vadd.f32 %v962_v63, %v961_v61 }
 0x107   : > { %v987_v4 = vadd.f32 %v986_v0, %v985_v62 }
 0x108   : > { %v629_v5 = vadd.f32 %v963_v3, %v1217_v35  ;;  %v644_v7 = vmax.f32 %v628_v1, 0.0  ;;  %v652_v8 = vmax.f32 %v636_v2, 0.0 }
 0x109   : > { %v637_v6 = vadd.f32 %v987_v4, %v1217_v35 }
 0x10a   : > { %v645_v9 = vmax.f32 %v629_v5, 0.0  ;;  %v964_v11 = vpop.f32.mrb[8].mxu0  ;;  %v988_v12 = vpop.f32.mrb[8].mxu1 }
 0x10b   : > { %v653_v10 = vmax.f32 %v637_v6, 0.0  ;;  %v965_v13 = vpop.f32.mrb[9].mxu0  ;;  %v989_v14 = vpop.f32.mrb[9].mxu1 }
 0x10c   : > { %v897_v15 = vpack.c.bf16 %v645_v9, %v644_v7  ;;  %v966_v17 = vadd.f32 %v965_v13, %v964_v11  ;;  %v990_v18 = vadd.f32 %v989_v14, %v988_v12  ;;  %v967_v19 = vpop.f32.mrb[10].mxu0  ;;  %v991_v20 = vpop.f32.mrb[10].mxu1 }
 0x10d   : > { %v917_v16 = vpack.c.bf16 %v653_v10, %v652_v8  ;;  %v968_v21 = vpop.f32.mrb[11].mxu0  ;;  %v992_v22 = vpop.f32.mrb[11].mxu1 }
 0x10e   : > { %929 = vst [vmem:[%s1227_s8 + $0x8] sm:$0xff] %v897_v15   ;;  %v630_v23 = vadd.f32 %v966_v17, %v1217_v35  ;;  %v638_v24 = vadd.f32 %v990_v18, %v1217_v35  ;;  %v969_v25 = vadd.f32 %v968_v21, %v967_v19  ;;  %v993_v26 = vadd.f32 %v992_v22, %v991_v20 }
 0x10f   : > { %933 = vst [vmem:[%s1227_s8 + $0x28] sm:$0xff] %v917_v16  }
 0x110   : > { %v631_v27 = vadd.f32 %v969_v25, %v1217_v35  ;;  %v639_v28 = vadd.f32 %v993_v26, %v1217_v35  ;;  %v646_v29 = vmax.f32 %v630_v23, 0.0  ;;  %v654_v30 = vmax.f32 %v638_v24, 0.0 }
 0x112   : > { %v647_v31 = vmax.f32 %v631_v27, 0.0  ;;  %v655_v32 = vmax.f32 %v639_v28, 0.0  ;;  %v970_v33 = vpop.f32.mrb[12].mxu0  ;;  %v994_v34 = vpop.f32.mrb[12].mxu1 }
 0x113   : > { %v971_v36 = vpop.f32.mrb[13].mxu0  ;;  %v995_v37 = vpop.f32.mrb[13].mxu1 }
 0x114   : > { %v902_v38 = vpack.c.bf16 %v647_v31, %v646_v29  ;;  %v922_v39 = vpack.c.bf16 %v655_v32, %v654_v30  ;;  %v972_v40 = vadd.f32 %v971_v36, %v970_v33  ;;  %v996_v41 = vadd.f32 %v995_v37, %v994_v34  ;;  %v973_v42 = vpop.f32.mrb[14].mxu0  ;;  %v997_v43 = vpop.f32.mrb[14].mxu1 }
 0x115   : > { %v974_v44 = vpop.f32.mrb[15].mxu0  ;;  %v998_v45 = vpop.f32.mrb[15].mxu1 }
 0x116   : > { %930 = vst [vmem:[%s1227_s8 + $0x10] sm:$0xff] %v902_v38   ;;  %934 = vst [vmem:[%s1227_s8 + $0x30] sm:$0xff] %v922_v39   ;;  %v632_v46 = vadd.f32 %v972_v40, %v1217_v35  ;;  %v640_v47 = vadd.f32 %v996_v41, %v1217_v35  ;;  %v975_v48 = vadd.f32 %v974_v44, %v973_v42 }
 0x117   : > { %v999_v49 = vadd.f32 %v998_v45, %v997_v43 }
 0x118   : > { %v633_v50 = vadd.f32 %v975_v48, %v1217_v35  ;;  %v648_v52 = vmax.f32 %v632_v46, 0.0  ;;  %v656_v53 = vmax.f32 %v640_v47, 0.0 }
 0x119   : > { %v641_v51 = vadd.f32 %v999_v49, %v1217_v35 }
 0x11a   : > { %v649_v54 = vmax.f32 %v633_v50, 0.0 }
 0x11b   : > { %v657_v55 = vmax.f32 %v641_v51, 0.0 }
 0x11c   : > { %v907_v56 = vpack.c.bf16 %v649_v54, %v648_v52 }
 0x11d   : > { %v927_v57 = vpack.c.bf16 %v657_v55, %v656_v53 }
 0x11e   : > { %931 = vst [vmem:[%s1227_s8 + $0x18] sm:$0xff] %v907_v56  }
 0x11f   : > { %935 = vst [vmem:[%s1227_s8 + $0x38] sm:$0xff] %v927_v57  }
 0x120 PF: > { %s13_s14 = sadd.s32 1, %s1102_s14   ;;  %s1262_s12 = smov %s1098_s13 }
 0x121   : > { %p10_p5 = scmp.ge.s32.totalorder %s13_s14, 4   ;;  %s1263_s13 = smov %s1265_s15 }
 0x123   :  { %12 = sbr.rel (!%p10_p5) target bundleno = 2 (0x2), region = 71 }

// kernel: gcn_net_forward.7
= control target key start
LH: loop header
LB: loop body
LE: loop exit
PB: predicated region body
PF: predicated region fallthrough
CT: control target
= control target key end

     0   :  { %s1224_s12 = smov 0   ;;  %s1226_s13 = smov 0   ;;  %s1564_s0 = inlined_call_operand.vmem [shape: bf16[256,256], index: 0, kind: input, shape index: {}]   ;;  %s1565_s1 = inlined_call_operand.vmem [shape: bf16[256,128], index: 1, kind: input, shape index: {}]   ;;  %s1566_s2 = inlined_call_operand.vmem [shape: f32[1,128], index: 2, kind: input, shape index: {}]   ;;  %s1567_s3 = inlined_call_operand.vmem [shape: f32[256,128], index: 3, kind: output, shape index: {}]  }
   0x1   :  { %s1228_s14 = smov 0  }
   0x2 LB: > { %s25_s15 = sadd.s32 1, %s1198_s13  ;;  %p930_p0 = scmp.ge.s32.totalorder %s1202_s14, 1  ;;  %s1202_s14 = sphi %s1228_s14, %s13_s14   ;;  %s1198_s13 = sphi %s1226_s13, %s1569_s13   ;;  %s1194_s12 = sphi %s1224_s12, %s1568_s12  }
   0x3   : > { %p27_p1 = scmp.ge.s32.totalorder %s25_s15, 2  ;;  %p158_p2 = scmp.lt.s32.totalorder %s1202_s14, 3 }
   0x5   : > { %s1571_s15 = smov (%p27_p1, %s25_s15), 0  ;;  %p159_p3 = pnand %p930_p0, %p158_p2 }
   0x6   : > { %v1076_v0 = vld [vmem:[%s1565_s1 + $0x40] sm:$0xff] (!%p159_p3)   ;;  %s931_s18 = sshll.u32 (!%p159_p3), %s1194_s12, 4  ;;  %v1078_v2 = vld [vmem:[%s1565_s1 + $0x48] sm:$0xff] (!%p159_p3)   ;;  %v1080_v4 = vld [vmem:[%s1565_s1 + $0x50] sm:$0xff] (!%p159_p3)   ;;  %v642_v32 = vlaneseq (!%p159_p3) }
   0x7   : > { %162 = sbr.rel (%p159_p3) target bundleno = 610 (0x262), region = 32  ;;  %v1077_v1 = vld [vmem:[%s1565_s1] sm:$0xff] (!%p159_p3)   ;;  %972 = vmatprep.subr.bf16.mxu0 (!%p159_p3), %v1076_v0  ;;  %1036 = vmatprep.subr.bf16.mxu1 (!%p159_p3), %v1076_v0  ;;  %v1079_v3 = vld [vmem:[%s1565_s1 + $0x8] sm:$0xff] (!%p159_p3)   ;;  %p189_p4 = scmp.lt.s32.totalorder (!%p159_p3), %s931_s18, 31  ;;  %v1081_v5 = vld [vmem:[%s1565_s1 + $0x10] sm:$0xff] (!%p159_p3)  }
   0x8   : > { %973 = vmatpush3.bf16.msra.mxu0 (!%p159_p3), %v1077_v1  ;;  %1044 = vmatpush3.bf16.msra.mxu1 (!%p159_p3), %v1077_v1  ;;  %v1082_v6 = vld [vmem:[%s1565_s1 + $0x58] sm:$0xff] (!%p159_p3)   ;;  %v1084_v8 = vld [vmem:[%s1565_s1 + $0x60] sm:$0xff] (!%p159_p3)   ;;  %v1086_v10 = vld [vmem:[%s1565_s1 + $0x68] sm:$0xff] (!%p159_p3)   ;;  %v1316_v33 = vand.u32 (!%p159_p3), 127, %v642_v32 }
   0x9   : > { %974 = vmatprep.subr.bf16.mxu0 (!%p159_p3), %v1078_v2  ;;  %1037 = vmatprep.subr.bf16.mxu1 (!%p159_p3), %v1078_v2  ;;  %v1083_v7 = vld [vmem:[%s1565_s1 + $0x18] sm:$0xff] (!%p159_p3)   ;;  %v1085_v9 = vld [vmem:[%s1565_s1 + $0x20] sm:$0xff] (!%p159_p3)   ;;  %v1087_v13 = vld [vmem:[%s1565_s1 + $0x28] sm:$0xff] (!%p159_p3)  }
   0xa   : > { %v1088_v14 = vld [vmem:[%s1565_s1 + $0x70] sm:$0xff] (!%p159_p3)   ;;  %v1090_v16 = vld [vmem:[%s1565_s1 + $0x78] sm:$0xff] (!%p159_p3)   ;;  %v1321_v38 = vld [vmem:[%s1566_s2] ss:$0 sm:$0xff] (!%p159_p3)  ;;  %vm644_vm0 = vcmp.lt.s32.totalorder (!%p159_p3), %v1316_v33, 8 }
   0xb   : > { %v1089_v15 = vld [vmem:[%s1565_s1 + $0x30] sm:$0xff] (!%p159_p3)   ;;  %v1091_v17 = vld [vmem:[%s1565_s1 + $0x38] sm:$0xff] (!%p159_p3)  }
   0xc   : > { %975 = vmatpush3.bf16.msra.mxu0 (!%p159_p3), %v1079_v3  ;;  %1045 = vmatpush3.bf16.msra.mxu1 (!%p159_p3), %v1079_v3 }
   0xd   : > { %976 = vmatprep.subr.bf16.mxu0 (!%p159_p3), %v1080_v4  ;;  %1038 = vmatprep.subr.bf16.mxu1 (!%p159_p3), %v1080_v4 }
   0xe   : > { %s1573_s18 = smov (!%p189_p4, %s931_s18), 31 }
   0xf   : > { %s971_s6 = sshll.u32 %s1573_s18, 3 }
  0x10   : > { %977 = vmatpush3.bf16.msra.mxu0 %v1081_v5  ;;  %1046 = vmatpush3.bf16.msra.mxu1 %v1081_v5  ;;  %s1277_s11 = scalar_lea.vmem %s1564_s0, %s971_s6  ;;  %s1521_s8 = scalar_lea.vmem %s1567_s3, %s971_s6 }
  0x11   : > { %978 = vmatprep.subr.bf16.mxu0 %v1082_v6  ;;  %1039 = vmatprep.subr.bf16.mxu1 %v1082_v6  ;;  %v1094_v11 = vld [vmem:[%s1277_s11 + $0x4] ss:$8 sps:$4 sm:$0xff]   ;;  %v1092_v18 = vld [vmem:[%s1277_s11] ss:$8 sps:$4 sm:$0xff]   ;;  %v1098_v20 = vld [vmem:[%s1277_s11 + $0x14] ss:$8 sps:$4 sm:$0xff]  }
  0x12   : > { %v1097_v12 = vld [vmem:[%s1277_s11 + $0x44] ss:$8 sps:$4 sm:$0xff]   ;;  %503 = vmatprep.mubr.bf16.mxu0 %v1094_v11  ;;  %v1095_v19 = vld [vmem:[%s1277_s11 + $0x40] ss:$8 sps:$4 sm:$0xff]   ;;  %v1101_v21 = vld [vmem:[%s1277_s11 + $0x54] ss:$8 sps:$4 sm:$0xff]  }
  0x13   : > { %535 = vmatprep.mubr.bf16.mxu1 %v1097_v12  ;;  %v1100_v22 = vld [vmem:[%s1277_s11 + $0x10] ss:$8 sps:$4 sm:$0xff]   ;;  %v1104_v24 = vld [vmem:[%s1277_s11 + $0x24] ss:$8 sps:$4 sm:$0xff]   ;;  %v1106_v26 = vld [vmem:[%s1277_s11 + $0x20] ss:$8 sps:$4 sm:$0xff]  }
  0x14   : > { %979 = vmatpush3.bf16.msra.mxu0 %v1083_v7  ;;  %1047 = vmatpush3.bf16.msra.mxu1 %v1083_v7  ;;  %v1103_v23 = vld [vmem:[%s1277_s11 + $0x50] ss:$8 sps:$4 sm:$0xff]   ;;  %v1107_v25 = vld [vmem:[%s1277_s11 + $0x64] ss:$8 sps:$4 sm:$0xff]   ;;  %v1109_v27 = vld [vmem:[%s1277_s11 + $0x60] ss:$8 sps:$4 sm:$0xff]  }
  0x15   : > { %980 = vmatprep.subr.bf16.mxu0 %v1084_v8  ;;  %1040 = vmatprep.subr.bf16.mxu1 %v1084_v8  ;;  %v1110_v28 = vld [vmem:[%s1277_s11 + $0x34] ss:$8 sps:$4 sm:$0xff]   ;;  %v1112_v30 = vld [vmem:[%s1277_s11 + $0x30] ss:$8 sps:$4 sm:$0xff]  }
  0x16   : > { %v1113_v29 = vld [vmem:[%s1277_s11 + $0x74] ss:$8 sps:$4 sm:$0xff]   ;;  %v1115_v31 = vld [vmem:[%s1277_s11 + $0x70] ss:$8 sps:$4 sm:$0xff]  }
  0x18   : > { %981 = vmatpush3.bf16.msra.mxu0 %v1085_v9  ;;  %1048 = vmatpush3.bf16.msra.mxu1 %v1085_v9 }
  0x19   : > { %982 = vmatprep.subr.bf16.mxu0 %v1086_v10  ;;  %1041 = vmatprep.subr.bf16.mxu1 %v1086_v10 }
  0x1c   : > { %983 = vmatpush3.bf16.msra.mxu0 %v1087_v13  ;;  %1049 = vmatpush3.bf16.msra.mxu1 %v1087_v13 }
  0x1d   : > { %984 = vmatprep.subr.bf16.mxu0 %v1088_v14  ;;  %1042 = vmatprep.subr.bf16.mxu1 %v1088_v14 }
  0x20   : > { %985 = vmatpush3.bf16.msra.mxu0 %v1089_v15  ;;  %1050 = vmatpush3.bf16.msra.mxu1 %v1089_v15 }
  0x21   : > { %986 = vmatprep.subr.bf16.mxu0 %v1090_v16  ;;  %1043 = vmatprep.subr.bf16.mxu1 %v1090_v16 }
  0x24   : > { %987 = vmatpush3.bf16.msra.mxu0 %v1091_v17  ;;  %1051 = vmatpush3.bf16.msra.mxu1 %v1091_v17 }
  0x27   : > { %504 = vmatmul.mubr.bf16.vlgmr.msra.gmra.mrb[0].mxu0 %v1092_v18  ;;  %536 = vmatmul.mubr.bf16.vlgmr.msra.gmra.mrb[0].mxu1 %v1095_v19 }
  0x28   : > { %511 = vmatprep.mubr.bf16.mxu0 %v1098_v20  ;;  %543 = vmatprep.mubr.bf16.mxu1 %v1101_v21 }
  0x2f   : > { %512 = vmatmul.mubr.bf16.gmra.mrb[4].mxu0 %v1100_v22  ;;  %544 = vmatmul.mubr.bf16.gmra.mrb[4].mxu1 %v1103_v23 }
  0x30   : > { %519 = vmatprep.mubr.bf16.mxu0 %v1104_v24  ;;  %551 = vmatprep.mubr.bf16.mxu1 %v1107_v25 }
  0x37   : > { %520 = vmatmul.mubr.bf16.gmra.mrb[8].mxu0 %v1106_v26  ;;  %552 = vmatmul.mubr.bf16.gmra.mrb[8].mxu1 %v1109_v27 }
  0x38   : > { %527 = vmatprep.mubr.bf16.mxu0 %v1110_v28  ;;  %559 = vmatprep.mubr.bf16.mxu1 %v1113_v29 }
  0x3f   : > { %528 = vmatmul.mubr.bf16.gmra.mrb[12].mxu0 %v1112_v30  ;;  %560 = vmatmul.mubr.bf16.gmra.mrb[12].mxu1 %v1115_v31 }
  0xfa   : > { %v988_v34 = vpop.f32.mrb[0].mxu0  ;;  %v1012_v35 = vpop.f32.mrb[0].mxu1 }
  0xfb   : > { %v989_v36 = vpop.f32.mrb[1].mxu0  ;;  %v1013_v37 = vpop.f32.mrb[1].mxu1 }
  0xfc   : > { %v990_v39 = vadd.f32 %v989_v36, %v988_v34  ;;  %v1014_v40 = vadd.f32 %v1013_v37, %v1012_v35  ;;  %v991_v41 = vpop.f32.mrb[2].mxu0  ;;  %v1015_v42 = vpop.f32.mrb[2].mxu1 }
  0xfd   : > { %v992_v43 = vpop.f32.mrb[3].mxu0  ;;  %v1016_v44 = vpop.f32.mrb[3].mxu1 }
  0xfe   : > { %v993_v45 = vadd.f32 %v992_v43, %v991_v41  ;;  %v1017_v46 = vadd.f32 %v1016_v44, %v1015_v42  ;;  %v626_v47 = vadd.f32 %v990_v39, %v1321_v38  ;;  %v634_v48 = vadd.f32 %v1014_v40, %v1321_v38 }
 0x100   : > { %v1328_v49 = vsel %vm644_vm0, %v626_v47, -inf  ;;  %v635_v50 = vadd.f32 %v1017_v46, %v1321_v38  ;;  %v1338_v53 = vsel %vm644_vm0, %v634_v48, -inf  ;;  %v627_v60 = vadd.f32 %v993_v45, %v1321_v38 }
 0x101   : > { %661 = vmax.xlane.f32.xlu0 %v1328_v49 }
 0x102   : > { %v994_v51 = vpop.f32.mrb[4].mxu0  ;;  %v1334_v52 = vsel %vm644_vm0, %v635_v50, -inf  ;;  %v1018_v54 = vpop.f32.mrb[4].mxu1  ;;  %v1351_v5 = vsel %vm644_vm0, %v627_v60, -inf }
 0x103   : > { %679 = vmax.xlane.f32.xlu1 %v1334_v52  ;;  %v995_v55 = vpop.f32.mrb[5].mxu0  ;;  %v1019_v56 = vpop.f32.mrb[5].mxu1 }
 0x104   : > { %v996_v57 = vadd.f32 %v995_v55, %v994_v51  ;;  %v997_v58 = vpop.f32.mrb[6].mxu0  ;;  %v1020_v59 = vadd.f32 %v1019_v56, %v1018_v54  ;;  %v1021_v61 = vpop.f32.mrb[6].mxu1 }
 0x105   : > { %677 = vmax.xlane.f32.xlu0 %v1338_v53  ;;  %v998_v62 = vpop.f32.mrb[7].mxu0  ;;  %v1022_v63 = vpop.f32.mrb[7].mxu1 }
 0x106   : > { %v999_v0 = vadd.f32 %v998_v62, %v997_v58  ;;  %v628_v1 = vadd.f32 %v996_v57, %v1321_v38  ;;  %v1023_v2 = vadd.f32 %v1022_v63, %v1021_v61  ;;  %v636_v3 = vadd.f32 %v1020_v59, %v1321_v38 }
 0x108   : > { %v1347_v4 = vsel %vm644_vm0, %v628_v1, -inf  ;;  %v629_v6 = vadd.f32 %v999_v0, %v1321_v38  ;;  %v637_v7 = vadd.f32 %v1023_v2, %v1321_v38  ;;  %v1363_v10 = vsel %vm644_vm0, %v636_v3, -inf }
 0x109   : > { %665 = vmax.xlane.f32.xlu1 %v1347_v4  ;;  %663 = vmax.xlane.f32.xlu0 %v1351_v5 }
 0x10a   : > { %v1000_v8 = vpop.f32.mrb[8].mxu0  ;;  %v1359_v9 = vsel %vm644_vm0, %v629_v6, -inf  ;;  %v1024_v11 = vpop.f32.mrb[8].mxu1  ;;  %v1369_v19 = vsel %vm644_vm0, %v637_v7, -inf }
 0x10b   : > { %v1001_v12 = vpop.f32.mrb[9].mxu0  ;;  %v1025_v13 = vpop.f32.mrb[9].mxu1 }
 0x10c   : > { %v1002_v14 = vadd.f32 %v1001_v12, %v1000_v8  ;;  %v1003_v15 = vpop.f32.mrb[10].mxu0  ;;  %v1026_v16 = vadd.f32 %v1025_v13, %v1024_v11  ;;  %v1027_v17 = vpop.f32.mrb[10].mxu1 }
 0x10d   : > { %667 = vmax.xlane.f32.xlu1 %v1359_v9  ;;  %681 = vmax.xlane.f32.xlu0 %v1363_v10  ;;  %v1004_v18 = vpop.f32.mrb[11].mxu0  ;;  %v1028_v20 = vpop.f32.mrb[11].mxu1 }
 0x10e   : > { %v1005_v21 = vadd.f32 %v1004_v18, %v1003_v15  ;;  %v630_v22 = vadd.f32 %v1002_v14, %v1321_v38  ;;  %v1029_v23 = vadd.f32 %v1028_v20, %v1027_v17  ;;  %v638_v24 = vadd.f32 %v1026_v16, %v1321_v38 }
 0x110   : > { %v1375_v25 = vsel %vm644_vm0, %v630_v22, -inf  ;;  %v631_v26 = vadd.f32 %v1005_v21, %v1321_v38  ;;  %v639_v27 = vadd.f32 %v1029_v23, %v1321_v38  ;;  %v1387_v30 = vsel %vm644_vm0, %v638_v24, -inf }
 0x111   : > { %683 = vmax.xlane.f32.xlu1 %v1369_v19  ;;  %669 = vmax.xlane.f32.xlu0 %v1375_v25 }
 0x112   : > { %v1006_v28 = vpop.f32.mrb[12].mxu0  ;;  %v1383_v29 = vsel %vm644_vm0, %v631_v26, -inf  ;;  %v1030_v31 = vpop.f32.mrb[12].mxu1  ;;  %v1393_v41 = vsel %vm644_vm0, %v639_v27, -inf }
 0x113   : > { %v1007_v32 = vpop.f32.mrb[13].mxu0  ;;  %v1031_v34 = vpop.f32.mrb[13].mxu1 }
 0x114   : > { %v1008_v35 = vadd.f32 %v1007_v32, %v1006_v28  ;;  %v1009_v36 = vpop.f32.mrb[14].mxu0  ;;  %v1032_v37 = vadd.f32 %v1031_v34, %v1030_v31  ;;  %v1033_v39 = vpop.f32.mrb[14].mxu1 }
 0x115   : > { %671 = vmax.xlane.f32.xlu1 %v1383_v29  ;;  %685 = vmax.xlane.f32.xlu0 %v1387_v30  ;;  %v1010_v40 = vpop.f32.mrb[15].mxu0  ;;  %v1034_v42 = vpop.f32.mrb[15].mxu1 }
 0x116   : > { %v1011_v43 = vadd.f32 %v1010_v40, %v1009_v36  ;;  %v632_v44 = vadd.f32 %v1008_v35, %v1321_v38  ;;  %v1035_v45 = vadd.f32 %v1034_v42, %v1033_v39  ;;  %v640_v46 = vadd.f32 %v1032_v37, %v1321_v38 }
 0x118   : > { %v1399_v47 = vsel %vm644_vm0, %v632_v44, -inf  ;;  %v633_v48 = vadd.f32 %v1011_v43, %v1321_v38  ;;  %v1410_v51 = vsel %vm644_vm0, %v640_v46, -inf  ;;  %v641_v54 = vadd.f32 %v1035_v45, %v1321_v38 }
 0x119   : > { %687 = vmax.xlane.f32.xlu1 %v1393_v41  ;;  %673 = vmax.xlane.f32.xlu0 %v1399_v47 }
 0x11a   : > { %v1406_v50 = vsel %vm644_vm0, %v633_v48, -inf  ;;  %v1417_v55 = vsel %vm644_vm0, %v641_v54, -inf }
 0x11d   : > { %675 = vmax.xlane.f32.xlu1 %v1406_v50  ;;  %689 = vmax.xlane.f32.xlu0 %v1410_v51 }
 0x121   : > { %691 = vmax.xlane.f32.xlu1 %v1417_v55 }
 0x18e   : > { %v662_v56 = vpop.xlane.xlu0 %661 }
 0x18f   : > { %v1421_v57 = vsub.f32 %v1328_v49, %v662_v56 }
 0x190   : > { %v680_v59 = vpop.xlane.xlu1 %679 }
 0x191   : > { %v709_v58 = vmul.f32 1.442695, %v1421_v57  ;;  %v1429_v62 = vsub.f32 %v1334_v52, %v680_v59 }
 0x192   : > { %v678_v60 = vpop.xlane.xlu0 %677 }
 0x193   : > { %1116 = vpow2.f32 %v709_v58  ;;  %v1425_v38 = vsub.f32 %v1338_v53, %v678_v60  ;;  %v727_v53 = vmul.f32 1.442695, %v1429_v62 }
 0x195   : > { %v725_v61 = vmul.f32 1.442695, %v1425_v38 }
 0x196   : > { %v666_v63 = vpop.xlane.xlu1 %665  ;;  %v664_v0 = vpop.xlane.xlu0 %663 }
 0x197   : > { %1118 = vpow2.f32 %v725_v61  ;;  %v1432_v1 = vsub.f32 %v1347_v4, %v666_v63  ;;  %v1435_v49 = vsub.f32 %v1351_v5, %v664_v0 }
 0x199   : > { %v713_v2 = vmul.f32 1.442695, %v1432_v1  ;;  %v711_v3 = vmul.f32 1.442695, %v1435_v49 }
 0x19a   : > { %v668_v6 = vpop.xlane.xlu1 %667  ;;  %v682_v7 = vpop.xlane.xlu0 %681 }
 0x19b   : > { %1120 = vpow2.f32 %v713_v2  ;;  %v1441_v52 = vsub.f32 %v1359_v9, %v668_v6  ;;  %v1444_v8 = vsub.f32 %v1363_v10, %v682_v7 }
 0x19c   : > { %1122 = vpow2.f32 %v711_v3 }
 0x19d   : > { %v1117_v4 = vpop.eup %1116  ;;  %v729_v5 = vmul.f32 1.442695, %v1444_v8  ;;  %1124 = vpow2.f32 %v727_v53  ;;  %v715_v11 = vmul.f32 1.442695, %v1441_v52 }
 0x19e   : > { %v684_v12 = vpop.xlane.xlu1 %683  ;;  %v670_v13 = vpop.xlane.xlu0 %669  ;;  %v741_v14 = vsel %vm644_vm0, %v1117_v4, 0.0 }
 0x19f   : > { %v1451_v15 = vsub.f32 %v1369_v19, %v684_v12  ;;  %v1454_v9 = vsub.f32 %v1375_v25, %v670_v13  ;;  %757 = vadd.xlane.f32.xlu0 %v741_v14  ;;  %1126 = vpow2.f32 %v729_v5 }
 0x1a0   : > { %1128 = vpow2.f32 %v715_v11 }
 0x1a1   : > { %v1119_v10 = vpop.eup %1118  ;;  %v717_v16 = vmul.f32 1.442695, %v1454_v9  ;;  %v731_v17 = vmul.f32 1.442695, %v1451_v15 }
 0x1a2   : > { %v672_v18 = vpop.xlane.xlu1 %671  ;;  %v686_v20 = vpop.xlane.xlu0 %685  ;;  %v749_v21 = vsel %vm644_vm0, %v1119_v10, 0.0 }
 0x1a3   : > { %v1461_v22 = vsub.f32 %v1383_v29, %v672_v18  ;;  %v1464_v19 = vsub.f32 %v1387_v30, %v686_v20  ;;  %773 = vadd.xlane.f32.xlu0 %v749_v21  ;;  %1130 = vpow2.f32 %v717_v16 }
 0x1a4   : > { %1132 = vpow2.f32 %v731_v17 }
 0x1a5   : > { %v1121_v23 = vpop.eup %1120  ;;  %v733_v24 = vmul.f32 1.442695, %v1464_v19  ;;  %v719_v26 = vmul.f32 1.442695, %v1461_v22 }
 0x1a6   : > { %v1123_v25 = vpop.eup %1122  ;;  %v688_v27 = vpop.xlane.xlu1 %687  ;;  %v743_v31 = vsel %vm644_vm0, %v1121_v23, 0.0 }
 0x1a7   : > { %v674_v28 = vpop.xlane.xlu0 %673  ;;  %v1471_v29 = vsub.f32 %v1393_v41, %v688_v27  ;;  %761 = vadd.xlane.f32.xlu0 %v743_v31  ;;  %v742_v32 = vsel %vm644_vm0, %v1123_v25, 0.0  ;;  %v1125_v34 = vpop.eup %1124  ;;  %1134 = vpow2.f32 %v733_v24 }
 0x1a8   : > { %v1474_v30 = vsub.f32 %v1399_v47, %v674_v28  ;;  %759 = vadd.xlane.f32.xlu1 %v742_v32  ;;  %1136 = vpow2.f32 %v719_v26  ;;  %v750_v43 = vsel %vm644_vm0, %v1125_v34, 0.0 }
 0x1a9   : > { %v1127_v36 = vpop.eup %1126  ;;  %v735_v37 = vmul.f32 1.442695, %v1471_v29 }
 0x1aa   : > { %v721_v35 = vmul.f32 1.442695, %v1474_v30  ;;  %v676_v39 = vpop.xlane.xlu1 %675  ;;  %v751_v44 = vsel %vm644_vm0, %v1127_v36, 0.0  ;;  %v1129_v45 = vpop.eup %1128 }
 0x1ab   : > { %v690_v40 = vpop.xlane.xlu0 %689  ;;  %v1481_v41 = vsub.f32 %v1406_v50, %v676_v39  ;;  %777 = vadd.xlane.f32.xlu0 %v751_v44  ;;  %v744_v54 = vsel %vm644_vm0, %v1129_v45, 0.0 }
 0x1ac   : > { %v1484_v42 = vsub.f32 %v1410_v51, %v690_v40  ;;  %1138 = vpow2.f32 %v721_v35  ;;  %775 = vadd.xlane.f32.xlu1 %v750_v43 }
 0x1ad   : > { %v1131_v47 = vpop.eup %1130  ;;  %1140 = vpow2.f32 %v735_v37  ;;  %v723_v48 = vmul.f32 1.442695, %v1481_v41 }
 0x1ae   : > { %v737_v46 = vmul.f32 1.442695, %v1484_v42  ;;  %v692_v50 = vpop.xlane.xlu1 %691  ;;  %v745_v56 = vsel %vm644_vm0, %v1131_v47, 0.0  ;;  %v1133_v58 = vpop.eup %1132 }
 0x1af   : > { %v1493_v51 = vsub.f32 %v1417_v55, %v692_v50  ;;  %765 = vadd.xlane.f32.xlu0 %v745_v56  ;;  %v752_v61 = vsel %vm644_vm0, %v1133_v58, 0.0 }
 0x1b0   : > { %1142 = vpow2.f32 %v737_v46  ;;  %763 = vadd.xlane.f32.xlu1 %v744_v54 }
 0x1b1   : > { %v1135_v59 = vpop.eup %1134  ;;  %1144 = vpow2.f32 %v723_v48  ;;  %v739_v60 = vmul.f32 1.442695, %v1493_v51 }
 0x1b2   : > { %v753_v55 = vsel %vm644_vm0, %v1135_v59, 0.0  ;;  %v1137_v63 = vpop.eup %1136 }
 0x1b3   : > { %781 = vadd.xlane.f32.xlu0 %v753_v55  ;;  %1146 = vpow2.f32 %v739_v60  ;;  %v746_v2 = vsel %vm644_vm0, %v1137_v63, 0.0 }
 0x1b4   : > { %779 = vadd.xlane.f32.xlu1 %v752_v61 }
 0x1b6   : > { %v1139_v0 = vpop.eup %1138 }
 0x1b7   : > { %v747_v3 = vsel %vm644_vm0, %v1139_v0, 0.0  ;;  %v1141_v53 = vpop.eup %1140 }
 0x1b8   : > { %767 = vadd.xlane.f32.xlu1 %v746_v2  ;;  %769 = vadd.xlane.f32.xlu0 %v747_v3  ;;  %v754_v7 = vsel %vm644_vm0, %v1141_v53, 0.0 }
 0x1ba   : > { %v1143_v6 = vpop.eup %1142 }
 0x1bb   : > { %v755_v4 = vsel %vm644_vm0, %v1143_v6, 0.0  ;;  %v1145_v5 = vpop.eup %1144 }
 0x1bc   : > { %783 = vadd.xlane.f32.xlu1 %v754_v7  ;;  %785 = vadd.xlane.f32.xlu0 %v755_v4  ;;  %v748_v11 = vsel %vm644_vm0, %v1145_v5, 0.0 }
 0x1bd   : > { %v1147_v12 = vpop.eup %1146 }
 0x1be   : > { %v756_v13 = vsel %vm644_vm0, %v1147_v12, 0.0 }
 0x1c0   : > { %771 = vadd.xlane.f32.xlu1 %v748_v11 }
 0x1c4   : > { %787 = vadd.xlane.f32.xlu1 %v756_v13 }
 0x22c   : > { %v758_v14 = vpop.xlane.xlu0 %757 }
 0x22d   : > { %1148 = vlog2.f32 %v758_v14 }
 0x230   : > { %v774_v10 = vpop.xlane.xlu0 %773 }
 0x231   : > { %1150 = vlog2.f32 %v774_v10 }
 0x234   : > { %v762_v16 = vpop.xlane.xlu0 %761 }
 0x235   : > { %v760_v17 = vpop.xlane.xlu1 %759  ;;  %1152 = vlog2.f32 %v762_v16 }
 0x236   : > { %1154 = vlog2.f32 %v760_v17 }
 0x237   : > { %v1149_v18 = vpop.eup %1148 }
 0x238   : > { %v790_v20 = vmul.f32 0.6931472, %v1149_v18  ;;  %v778_v21 = vpop.xlane.xlu0 %777 }
 0x239   : > { %v776_v33 = vpop.xlane.xlu1 %775 }
 0x23a   : > { %v821_v23 = vsub.f32 %v1421_v57, %v790_v20  ;;  %1156 = vlog2.f32 %v776_v33 }
 0x23b   : > { %v1151_v24 = vpop.eup %1150  ;;  %1158 = vlog2.f32 %v778_v21 }
 0x23c   : > { %837 = vst [vmem:[%s1521_s8] sm:$0xff] %v821_v23  ;;  %v806_v25 = vmul.f32 0.6931472, %v1151_v24  ;;  %v766_v27 = vpop.xlane.xlu0 %765 }
 0x23d   : > { %v764_v26 = vpop.xlane.xlu1 %763 }
 0x23e   : > { %v829_v28 = vsub.f32 %v1425_v38, %v806_v25  ;;  %1160 = vlog2.f32 %v764_v26 }
 0x23f   : > { %v1153_v31 = vpop.eup %1152  ;;  %1162 = vlog2.f32 %v766_v27 }
 0x240   : > { %v1155_v32 = vpop.eup %1154  ;;  %845 = vst [vmem:[%s1521_s8 + $0x40] sm:$0xff] %v829_v28  ;;  %v794_v34 = vmul.f32 0.6931472, %v1153_v31  ;;  %v782_v57 = vpop.xlane.xlu0 %781 }
 0x241   : > { %v792_v35 = vmul.f32 0.6931472, %v1155_v32  ;;  %v780_v36 = vpop.xlane.xlu1 %779 }
 0x242   : > { %v823_v37 = vsub.f32 %v1432_v1, %v794_v34  ;;  %1164 = vlog2.f32 %v780_v36 }
 0x243   : > { %v822_v39 = vsub.f32 %v1435_v49, %v792_v35  ;;  %1166 = vlog2.f32 %v782_v57 }
 0x244   : > { %v1157_v40 = vpop.eup %1156  ;;  %839 = vst [vmem:[%s1521_s8 + $0x10] sm:$0xff] %v823_v37 }
 0x245   : > { %v1159_v38 = vpop.eup %1158  ;;  %838 = vst [vmem:[%s1521_s8 + $0x8] sm:$0xff] %v822_v39  ;;  %v808_v43 = vmul.f32 0.6931472, %v1157_v40  ;;  %v768_v44 = vpop.xlane.xlu1 %767 }
 0x246   : > { %v770_v45 = vpop.xlane.xlu0 %769  ;;  %v810_v46 = vmul.f32 0.6931472, %v1159_v38  ;;  %1168 = vlog2.f32 %v768_v44 }
 0x247   : > { %v830_v47 = vsub.f32 %v1429_v62, %v808_v43  ;;  %1170 = vlog2.f32 %v770_v45 }
 0x248   : > { %v1161_v1 = vpop.eup %1160  ;;  %v831_v48 = vsub.f32 %v1444_v8, %v810_v46 }
 0x249   : > { %v1163_v49 = vpop.eup %1162  ;;  %846 = vst [vmem:[%s1521_s8 + $0x48] sm:$0xff] %v830_v47  ;;  %v796_v50 = vmul.f32 0.6931472, %v1161_v1  ;;  %v784_v54 = vpop.xlane.xlu1 %783 }
 0x24a   : > { %v786_v56 = vpop.xlane.xlu0 %785  ;;  %847 = vst [vmem:[%s1521_s8 + $0x50] sm:$0xff] %v831_v48  ;;  %v798_v58 = vmul.f32 0.6931472, %v1163_v49  ;;  %1172 = vlog2.f32 %v784_v54 }
 0x24b   : > { %v824_v59 = vsub.f32 %v1441_v52, %v796_v50  ;;  %1174 = vlog2.f32 %v786_v56 }
 0x24c   : > { %v1165_v60 = vpop.eup %1164  ;;  %v825_v62 = vsub.f32 %v1454_v9, %v798_v58 }
 0x24d   : > { %v1167_v61 = vpop.eup %1166  ;;  %840 = vst [vmem:[%s1521_s8 + $0x18] sm:$0xff] %v824_v59  ;;  %v812_v8 = vmul.f32 0.6931472, %v1165_v60  ;;  %v772_v55 = vpop.xlane.xlu1 %771 }
 0x24e   : > { %841 = vst [vmem:[%s1521_s8 + $0x20] sm:$0xff] %v825_v62  ;;  %v814_v63 = vmul.f32 0.6931472, %v1167_v61  ;;  %1176 = vlog2.f32 %v772_v55 }
 0x24f   : > { %v832_v0 = vsub.f32 %v1451_v15, %v812_v8 }
 0x250   : > { %v1169_v2 = vpop.eup %1168  ;;  %v833_v3 = vsub.f32 %v1464_v19, %v814_v63 }
 0x251   : > { %v1171_v52 = vpop.eup %1170  ;;  %848 = vst [vmem:[%s1521_s8 + $0x58] sm:$0xff] %v832_v0  ;;  %v800_v53 = vmul.f32 0.6931472, %v1169_v2  ;;  %v788_v6 = vpop.xlane.xlu1 %787 }
 0x252   : > { %849 = vst [vmem:[%s1521_s8 + $0x60] sm:$0xff] %v833_v3  ;;  %v802_v9 = vmul.f32 0.6931472, %v1171_v52  ;;  %1178 = vlog2.f32 %v788_v6 }
 0x253   : > { %v826_v7 = vsub.f32 %v1461_v22, %v800_v53 }
 0x254   : > { %v1173_v4 = vpop.eup %1172  ;;  %v827_v5 = vsub.f32 %v1474_v30, %v802_v9 }
 0x255   : > { %v1175_v15 = vpop.eup %1174  ;;  %842 = vst [vmem:[%s1521_s8 + $0x28] sm:$0xff] %v826_v7  ;;  %v816_v11 = vmul.f32 0.6931472, %v1173_v4 }
 0x256   : > { %843 = vst [vmem:[%s1521_s8 + $0x30] sm:$0xff] %v827_v5  ;;  %v818_v19 = vmul.f32 0.6931472, %v1175_v15 }
 0x257   : > { %v834_v12 = vsub.f32 %v1471_v29, %v816_v11 }
 0x258   : > { %v1177_v13 = vpop.eup %1176  ;;  %v835_v14 = vsub.f32 %v1484_v42, %v818_v19 }
 0x259   : > { %850 = vst [vmem:[%s1521_s8 + $0x68] sm:$0xff] %v834_v12  ;;  %v804_v10 = vmul.f32 0.6931472, %v1177_v13 }
 0x25a   : > { %851 = vst [vmem:[%s1521_s8 + $0x70] sm:$0xff] %v835_v14 }
 0x25b   : > { %v828_v22 = vsub.f32 %v1481_v41, %v804_v10 }
 0x25c   : > { %v1179_v16 = vpop.eup %1178 }
 0x25d   : > { %844 = vst [vmem:[%s1521_s8 + $0x38] sm:$0xff] %v828_v22  ;;  %v820_v17 = vmul.f32 0.6931472, %v1179_v16 }
 0x25f   : > { %v836_v30 = vsub.f32 %v1493_v51, %v820_v17 }
 0x261   : > { %852 = vst [vmem:[%s1521_s8 + $0x78] sm:$0xff] %v836_v30 }
 0x262 PF: > { %s13_s14 = sadd.s32 1, %s1202_s14   ;;  %s1568_s12 = smov %s1198_s13 }
 0x263   : > { %p10_p5 = scmp.ge.s32.totalorder %s13_s14, 4   ;;  %s1569_s13 = smov %s1571_s15 }
 0x265   :  { %12 = sbr.rel (!%p10_p5) target bundleno = 2 (0x2), region = 71 }

// kernel: gcn_net_forward.4
= control target key start
LH: loop header
LB: loop body
LE: loop exit
PB: predicated region body
PF: predicated region fallthrough
CT: control target
= control target key end

     0   :  { %s959_s1 = inlined_call_operand.vmem [shape: bf16[128,128], index: 1, kind: input, shape index: {}]   ;;  %s960_s0 = inlined_call_operand.vmem [shape: bf16[256,128], index: 0, kind: input, shape index: {}]   ;;  %s961_s2 = inlined_call_operand.vmem [shape: bf16[256,128], index: 2, kind: output, shape index: {}]  }
   0x1   :  { %v800_v0 = vld [vmem:[%s959_s1] sm:$0xff]   ;;  %v801_v1 = vld [vmem:[%s959_s1 + $0x8] sm:$0xff]   ;;  %v802_v2 = vld [vmem:[%s959_s1 + $0x10] sm:$0xff]  }
   0x2   :  { %736 = vmatprep.subr.bf16.mxu0 %v800_v0  ;;  %784 = vmatprep.subr.bf16.mxu1 %v800_v0  ;;  %v803_v3 = vld [vmem:[%s959_s1 + $0x18] sm:$0xff]   ;;  %v808_v4 = vld [vmem:[%s960_s0] sm:$0xff]   ;;  %v805_v7 = vld [vmem:[%s959_s1 + $0x28] sm:$0xff]  }
   0x3   :  { %737 = vmatpush3.bf16.msra.mxu0 %v800_v0  ;;  %792 = vmatpush3.bf16.msra.mxu1 %v800_v0  ;;  %v809_v5 = vld [vmem:[%s960_s0 + $0x40] sm:$0xff]   ;;  %v806_v8 = vld [vmem:[%s959_s1 + $0x30] sm:$0xff]   ;;  %v807_v9 = vld [vmem:[%s959_s1 + $0x38] sm:$0xff]  }
   0x4   :  { %738 = vmatprep.subr.bf16.mxu0 %v801_v1  ;;  %785 = vmatprep.subr.bf16.mxu1 %v801_v1  ;;  %v804_v6 = vld [vmem:[%s959_s1 + $0x20] sm:$0xff]   ;;  %v810_v10 = vld [vmem:[%s960_s0 + $0x8] sm:$0xff]   ;;  %v812_v12 = vld [vmem:[%s960_s0 + $0x10] sm:$0xff]  }
   0x5   :  { %752 = vmatprep.mubr.bf16.mxu0 %v808_v4  ;;  %768 = vmatprep.mubr.bf16.mxu1 %v809_v5  ;;  %v811_v11 = vld [vmem:[%s960_s0 + $0x48] sm:$0xff]   ;;  %v813_v13 = vld [vmem:[%s960_s0 + $0x50] sm:$0xff]   ;;  %v814_v14 = vld [vmem:[%s960_s0 + $0x18] sm:$0xff]  }
   0x6   :  { %v815_v15 = vld [vmem:[%s960_s0 + $0x58] sm:$0xff]   ;;  %v816_v16 = vld [vmem:[%s960_s0 + $0x20] sm:$0xff]   ;;  %v818_v18 = vld [vmem:[%s960_s0 + $0x28] sm:$0xff]  }
   0x7   :  { %739 = vmatpush3.bf16.msra.mxu0 %v801_v1  ;;  %793 = vmatpush3.bf16.msra.mxu1 %v801_v1  ;;  %v817_v17 = vld [vmem:[%s960_s0 + $0x60] sm:$0xff]   ;;  %v819_v19 = vld [vmem:[%s960_s0 + $0x68] sm:$0xff]   ;;  %v820_v20 = vld [vmem:[%s960_s0 + $0x30] sm:$0xff]  }
   0x8   :  { %740 = vmatprep.subr.bf16.mxu0 %v802_v2  ;;  %786 = vmatprep.subr.bf16.mxu1 %v802_v2  ;;  %v821_v21 = vld [vmem:[%s960_s0 + $0x70] sm:$0xff]   ;;  %v822_v22 = vld [vmem:[%s960_s0 + $0x38] sm:$0xff]  }
   0x9   :  { %v823_v23 = vld [vmem:[%s960_s0 + $0x78] sm:$0xff]  }
   0xb   :  { %741 = vmatpush3.bf16.msra.mxu0 %v802_v2  ;;  %794 = vmatpush3.bf16.msra.mxu1 %v802_v2 }
   0xc   :  { %742 = vmatprep.subr.bf16.mxu0 %v803_v3  ;;  %787 = vmatprep.subr.bf16.mxu1 %v803_v3 }
   0xf   :  { %743 = vmatpush3.bf16.msra.mxu0 %v803_v3  ;;  %795 = vmatpush3.bf16.msra.mxu1 %v803_v3 }
  0x10   :  { %744 = vmatprep.subr.bf16.mxu0 %v804_v6  ;;  %788 = vmatprep.subr.bf16.mxu1 %v804_v6 }
  0x13   :  { %745 = vmatpush3.bf16.msra.mxu0 %v804_v6  ;;  %796 = vmatpush3.bf16.msra.mxu1 %v804_v6 }
  0x14   :  { %746 = vmatprep.subr.bf16.mxu0 %v805_v7  ;;  %789 = vmatprep.subr.bf16.mxu1 %v805_v7 }
  0x17   :  { %747 = vmatpush3.bf16.msra.mxu0 %v805_v7  ;;  %797 = vmatpush3.bf16.msra.mxu1 %v805_v7 }
  0x18   :  { %748 = vmatprep.subr.bf16.mxu0 %v806_v8  ;;  %790 = vmatprep.subr.bf16.mxu1 %v806_v8 }
  0x1b   :  { %749 = vmatpush3.bf16.msra.mxu0 %v806_v8  ;;  %798 = vmatpush3.bf16.msra.mxu1 %v806_v8 }
  0x1c   :  { %750 = vmatprep.subr.bf16.mxu0 %v807_v9  ;;  %791 = vmatprep.subr.bf16.mxu1 %v807_v9 }
  0x1f   :  { %751 = vmatpush3.bf16.msra.mxu0 %v807_v9  ;;  %799 = vmatpush3.bf16.msra.mxu1 %v807_v9 }
  0x22   :  { %753 = vmatmul.mubr.bf16.vlgmr.msra.gmra.mrb[0].mxu0 %v810_v10  ;;  %769 = vmatmul.mubr.bf16.vlgmr.msra.gmra.mrb[0].mxu1 %v811_v11 }
  0x23   :  { %756 = vmatprep.mubr.bf16.mxu0 %v812_v12  ;;  %772 = vmatprep.mubr.bf16.mxu1 %v813_v13 }
  0x2a   :  { %757 = vmatmul.mubr.bf16.gmra.mrb[4].mxu0 %v814_v14  ;;  %773 = vmatmul.mubr.bf16.gmra.mrb[4].mxu1 %v815_v15 }
  0x2b   :  { %760 = vmatprep.mubr.bf16.mxu0 %v816_v16  ;;  %776 = vmatprep.mubr.bf16.mxu1 %v817_v17 }
  0x32   :  { %761 = vmatmul.mubr.bf16.gmra.mrb[8].mxu0 %v818_v18  ;;  %777 = vmatmul.mubr.bf16.gmra.mrb[8].mxu1 %v819_v19 }
  0x33   :  { %764 = vmatprep.mubr.bf16.mxu0 %v820_v20  ;;  %780 = vmatprep.mubr.bf16.mxu1 %v821_v21 }
  0x3a   :  { %765 = vmatmul.mubr.bf16.gmra.mrb[12].mxu0 %v822_v22  ;;  %781 = vmatmul.mubr.bf16.gmra.mrb[12].mxu1 %v823_v23 }
  0xf5   :  { %v754_v24 = vpop.f32.mrb[0].mxu0  ;;  %v770_v25 = vpop.f32.mrb[0].mxu1 }
  0xf6   :  { %v238_v26 = vpop.f32.mrb[1].mxu0  ;;  %v302_v27 = vpop.f32.mrb[1].mxu1 }
  0xf7   :  { %v755_v28 = vpop.f32.mrb[2].mxu0  ;;  %v771_v29 = vpop.f32.mrb[2].mxu1 }
  0xf8   :  { %v625_v30 = vpack.c.bf16 %v755_v28, %v754_v24  ;;  %v665_v31 = vpack.c.bf16 %v771_v29, %v770_v25  ;;  %v241_v32 = vpop.f32.mrb[3].mxu0  ;;  %v305_v33 = vpop.f32.mrb[3].mxu1 }
  0xf9   :  { %v620_v34 = vpack.c.bf16 %v241_v32, %v238_v26  ;;  %v660_v35 = vpack.c.bf16 %v305_v33, %v302_v27 }
  0xfa   :  { %697 = vst [vmem:[%s961_s2 + $0x8] sm:$0xff] %v625_v30   ;;  %705 = vst [vmem:[%s961_s2 + $0x48] sm:$0xff] %v665_v31  }
  0xfb   :  { %621 = vst [vmem:[%s961_s2] sm:$0xff] %v620_v34   ;;  %704 = vst [vmem:[%s961_s2 + $0x40] sm:$0xff] %v660_v35  }
  0xfd   :  { %v758_v36 = vpop.f32.mrb[4].mxu0  ;;  %v774_v37 = vpop.f32.mrb[4].mxu1 }
  0xfe   :  { %v254_v38 = vpop.f32.mrb[5].mxu0  ;;  %v318_v39 = vpop.f32.mrb[5].mxu1 }
  0xff   :  { %v759_v40 = vpop.f32.mrb[6].mxu0  ;;  %v775_v41 = vpop.f32.mrb[6].mxu1 }
 0x100   :  { %v635_v42 = vpack.c.bf16 %v759_v40, %v758_v36  ;;  %v675_v43 = vpack.c.bf16 %v775_v41, %v774_v37  ;;  %v257_v44 = vpop.f32.mrb[7].mxu0  ;;  %v321_v45 = vpop.f32.mrb[7].mxu1 }
 0x101   :  { %v630_v46 = vpack.c.bf16 %v257_v44, %v254_v38  ;;  %v670_v47 = vpack.c.bf16 %v321_v45, %v318_v39 }
 0x102   :  { %699 = vst [vmem:[%s961_s2 + $0x18] sm:$0xff] %v635_v42   ;;  %707 = vst [vmem:[%s961_s2 + $0x58] sm:$0xff] %v675_v43  }
 0x103   :  { %698 = vst [vmem:[%s961_s2 + $0x10] sm:$0xff] %v630_v46   ;;  %706 = vst [vmem:[%s961_s2 + $0x50] sm:$0xff] %v670_v47  }
 0x105   :  { %v762_v48 = vpop.f32.mrb[8].mxu0  ;;  %v778_v49 = vpop.f32.mrb[8].mxu1 }
 0x106   :  { %v270_v50 = vpop.f32.mrb[9].mxu0  ;;  %v334_v51 = vpop.f32.mrb[9].mxu1 }
 0x107   :  { %v763_v52 = vpop.f32.mrb[10].mxu0  ;;  %v779_v53 = vpop.f32.mrb[10].mxu1 }
 0x108   :  { %v645_v54 = vpack.c.bf16 %v763_v52, %v762_v48  ;;  %v685_v55 = vpack.c.bf16 %v779_v53, %v778_v49  ;;  %v273_v56 = vpop.f32.mrb[11].mxu0  ;;  %v337_v57 = vpop.f32.mrb[11].mxu1 }
 0x109   :  { %v640_v58 = vpack.c.bf16 %v273_v56, %v270_v50  ;;  %v680_v59 = vpack.c.bf16 %v337_v57, %v334_v51 }
 0x10a   :  { %701 = vst [vmem:[%s961_s2 + $0x28] sm:$0xff] %v645_v54   ;;  %709 = vst [vmem:[%s961_s2 + $0x68] sm:$0xff] %v685_v55  }
 0x10b   :  { %700 = vst [vmem:[%s961_s2 + $0x20] sm:$0xff] %v640_v58   ;;  %708 = vst [vmem:[%s961_s2 + $0x60] sm:$0xff] %v680_v59  }
 0x10d   :  { %v766_v60 = vpop.f32.mrb[12].mxu0  ;;  %v782_v61 = vpop.f32.mrb[12].mxu1 }
 0x10e   :  { %v286_v62 = vpop.f32.mrb[13].mxu0  ;;  %v350_v63 = vpop.f32.mrb[13].mxu1 }
 0x10f   :  { %v767_v0 = vpop.f32.mrb[14].mxu0  ;;  %v783_v1 = vpop.f32.mrb[14].mxu1 }
 0x110   :  { %v655_v2 = vpack.c.bf16 %v767_v0, %v766_v60  ;;  %v695_v3 = vpack.c.bf16 %v783_v1, %v782_v61  ;;  %v289_v4 = vpop.f32.mrb[15].mxu0  ;;  %v353_v5 = vpop.f32.mrb[15].mxu1 }
 0x111   :  { %v650_v6 = vpack.c.bf16 %v289_v4, %v286_v62  ;;  %v690_v7 = vpack.c.bf16 %v353_v5, %v350_v63 }
 0x112   :  { %703 = vst [vmem:[%s961_s2 + $0x38] sm:$0xff] %v655_v2   ;;  %711 = vst [vmem:[%s961_s2 + $0x78] sm:$0xff] %v695_v3  }
 0x113   :  { %702 = vst [vmem:[%s961_s2 + $0x30] sm:$0xff] %v650_v6   ;;  %710 = vst [vmem:[%s961_s2 + $0x70] sm:$0xff] %v690_v7  }

</bundles_post_ra>
